<compile_context>
chip_gen: v7x
topology: tpu7x:2x2x1
jax: 0.10.0
libtpu: 0.0.40
codegen_flags: <defaults>
</compile_context>

<pallas_src>
from functools import partial

import jax
import jax.numpy as jnp
from jax import lax
from jax.experimental import pallas as pl
from jax.experimental.pallas import tpu as pltpu

EPS = 1e-5  # PyTorch BatchNorm2d default eps


def classifier_kernel(patches_ref, w1_ref, b1_ref, w2_ref, b2_ref,
                      s2_ref, t2_ref, w3_ref, b3_ref, out_ref):
    f32 = jnp.float32
    bf16 = jnp.bfloat16
    q, s, tb, feat = patches_ref.shape            # (4, 4, TB, 1152)
    rows = q * s * tb                             # 16 * TB, rows ordered (q, s, n)

    patches = patches_ref[...].reshape(rows, feat)

    # conv_1 (3x3, stride 1, pad 1) as im2col matmul; BN1 pre-folded into w1/b1.
    # dropout_1 = identity (eval); relu_1.
    h = jnp.dot(patches, w1_ref[...], preferred_element_type=f32) + b1_ref[...]
    h = jnp.maximum(h, 0.0)

    # conv_2 (1x1) as matmul + bias; dropout_2 = identity (eval).
    h = jnp.dot(h.astype(bf16), w2_ref[...], preferred_element_type=f32) + b2_ref[...]

    # pool_2 (2x2 max): rows ordered (q, s, n) -> elementwise max over the 4 q-blocks.
    blk = s * tb                                  # 4 * TB (sublane aligned, TB % 8 == 0)
    p = jnp.maximum(jnp.maximum(h[0:blk], h[blk:2 * blk]),
                    jnp.maximum(h[2 * blk:3 * blk], h[3 * blk:4 * blk]))

    # bn_2 (running stats, precomputed scale/shift; applied post-pool exactly like
    # the PyTorch graph, so it stays correct even for negative gamma); relu_2.
    p = p * s2_ref[...] + t2_ref[...]
    p = jnp.maximum(p, 0.0)

    # flatten_3 + linear_3 as ONE matmul: stack the four pooled-position slices along
    # lanes -> (TB, 1024) whose lane order (s*256 + c) matches the restacked w3 rows.
    flat = jnp.concatenate([p[i * tb:(i + 1) * tb] for i in range(4)], axis=1)
    out_ref[...] = jnp.dot(flat.astype(bf16), w3_ref[...],
                           preferred_element_type=f32) + b3_ref[...]


def _im2col_pool_ordered(x_nchw, npad):
    """(N,C,4,4) NCHW -> (4, 4, npad, 9C) bf16 patches, axes (q, s, n, feature)."""
    N, C, H, W = x_nchw.shape
    xt = jnp.transpose(x_nchw, (0, 2, 3, 1)).astype(jnp.bfloat16)        # NHWC, bf16
    xp = jnp.pad(xt, ((0, npad - N), (1, 1), (1, 1), (0, 0)))
    cols = [xp[:, ky:ky + H, kx:kx + W, :] for ky in range(3) for kx in range(3)]
    pat = jnp.concatenate(cols, axis=-1)                                 # (npad,H,W,9C)
    pat = pat.reshape(npad, H // 2, 2, W // 2, 2, 9 * C)                 # (n,py,dy,px,dx,F)
    pat = jnp.transpose(pat, (2, 4, 1, 3, 0, 5))                         # (dy,dx,py,px,n,F)
    return pat.reshape(4, 4, npad, 9 * C)                                # q=2dy+dx, s=2py+px


@partial(jax.jit, static_argnames=("tb",))
def classifier_cnn_large(x, params, *, tb=256):
    N = x.shape[0]
    f32, bf16 = jnp.float32, jnp.bfloat16
    row2 = lambda a: a.reshape(1, -1).astype(f32)

    # --- batch padding / tiling ---------------------------------------------------
    npad8 = ((N + 7) // 8) * 8                    # sublane alignment
    tb = min(tb, npad8)                           # tb stays a multiple of 8
    npad = ((npad8 + tb - 1) // tb) * tb
    grid = (npad // tb,)

    # --- parameter preprocessing (all folding done once, outside the kernel) -------
    # BN1 folded into conv1 (BN directly follows conv1 -> exact).
    s1 = params["bn1_g"] * lax.rsqrt(params["bn1_v"] + EPS)
    w1col = jnp.transpose(params["conv1_w"], (2, 3, 1, 0)).reshape(9 * 128, 256)
    w1col = (w1col * s1[None, :]).astype(bf16)
    b1 = row2((params["conv1_b"] - params["bn1_m"]) * s1 + params["bn1_b"])

    # conv2 1x1 weight as (Cin, Cout).  BN2 kept as a post-pool scale/shift because
    # folding it into conv2 would commute an affine map past a max-pool (only valid
    # for non-negative gamma).
    w2mat = params["conv2_w"][:, :, 0, 0].T.astype(bf16)
    b2 = row2(params["conv2_b"])
    s2v = params["bn2_g"] * lax.rsqrt(params["bn2_v"] + EPS)
    t2 = row2(params["bn2_b"] - params["bn2_m"] * s2v)
    s2 = row2(s2v)

    # Final linear: torch flatten feature order is c*4 + (2*py+px); restack rows to
    # s*256 + c so a single (TB,1024)@(1024,10) matmul matches.
    w3stack = jnp.transpose(params["lin_w"].reshape(10, 256, 2, 2),
                            (2, 3, 1, 0)).reshape(4 * 256, 10).astype(bf16)
    b3 = row2(params["lin_b"])

    patches = _im2col_pool_ordered(x, npad)                              # (4,4,npad,1152) bf16

    args = [patches, w1col, b1, w2mat, b2, s2, t2, w3stack, b3]

    def const_spec(a):
        nd = a.ndim
        return pl.BlockSpec(a.shape, lambda i, nd=nd: (0,) * nd)         # resident weights

    in_specs = ([pl.BlockSpec((4, 4, tb, 9 * 128), lambda i: (0, 0, i, 0))] +
                [const_spec(a) for a in args[1:]])

    flops = (2 * 16 * npad * 1152 * 256          # conv1 im2col matmul
             + 2 * 16 * npad * 256 * 256         # conv2 1x1 matmul
             + 2 * npad * 1024 * 10)             # final linear
    bytes_accessed = (sum(a.size * a.dtype.itemsize for a in args) + npad * 10 * 4)
    cost = pl.CostEstimate(flops=flops, transcendentals=0, bytes_accessed=bytes_accessed)

    out = pl.pallas_call(
        classifier_kernel,
        out_shape=jax.ShapeDtypeStruct((npad, 10), jnp.float32),
        grid=grid,
        in_specs=in_specs,
        out_specs=pl.BlockSpec((tb, 10), lambda i: (i, 0)),
        compiler_params=pltpu.CompilerParams(
            dimension_semantics=("parallel",),
            vmem_limit_bytes=64 << 20),
        cost_estimate=cost,
    )(*args)
    return out[:N]


def reference(x, params):
    """Pure-JAX eval-mode reference mirroring the PyTorch forward (NCHW, f32)."""
    P = lax.Precision.HIGHEST
    dn = ("NCHW", "OIHW", "NCHW")
    cvec = lambda a: a[None, :, None, None]
    y = lax.conv_general_dilated(x, params["conv1_w"], (1, 1), ((1, 1), (1, 1)),
                                 dimension_numbers=dn, precision=P) + cvec(params["conv1_b"])
    y = (y - cvec(params["bn1_m"])) * cvec(params["bn1_g"] / jnp.sqrt(params["bn1_v"] + EPS)) \
        + cvec(params["bn1_b"])
    y = jnp.maximum(y, 0.0)
    y = lax.conv_general_dilated(y, params["conv2_w"], (1, 1), ((0, 0), (0, 0)),
                                 dimension_numbers=dn, precision=P) + cvec(params["conv2_b"])
    y = lax.reduce_window(y, -jnp.inf, lax.max, (1, 1, 2, 2), (1, 1, 2, 2), "VALID")
    y = (y - cvec(params["bn2_m"])) * cvec(params["bn2_g"] / jnp.sqrt(params["bn2_v"] + EPS)) \
        + cvec(params["bn2_b"])
    y = jnp.maximum(y, 0.0)
    y = y.reshape(y.shape[0], -1)                        # PyTorch flatten order (C,H,W)
    return jnp.dot(y, params["lin_w"].T, precision=P) + params["lin_b"]


if __name__ == "__main__":
    f32 = jnp.float32
    keys = jax.random.split(jax.random.PRNGKey(0), 16)
    params = dict(
        conv1_w=0.03 * jax.random.normal(keys[0], (256, 128, 3, 3), f32),
        conv1_b=0.02 * jax.random.normal(keys[1], (256,), f32),
        bn1_g=1.0 + 0.1 * jax.random.normal(keys[2], (256,), f32),
        bn1_b=0.1 * jax.random.normal(keys[3], (256,), f32),
        bn1_m=0.1 * jax.random.normal(keys[4], (256,), f32),
        bn1_v=jax.random.uniform(keys[5], (256,), f32, 0.5, 1.5),
        conv2_w=0.06 * jax.random.normal(keys[6], (256, 256, 1, 1), f32),
        conv2_b=0.02 * jax.random.normal(keys[7], (256,), f32),
        bn2_g=1.0 + 0.1 * jax.random.normal(keys[8], (256,), f32),
        bn2_b=0.1 * jax.random.normal(keys[9], (256,), f32),
        bn2_m=0.1 * jax.random.normal(keys[10], (256,), f32),
        bn2_v=jax.random.uniform(keys[11], (256,), f32, 0.5, 1.5),
        lin_w=0.03 * jax.random.normal(keys[12], (10, 1024), f32),
        lin_b=0.02 * jax.random.normal(keys[13], (10,), f32),
    )
    # Linear(1024) => spatial is 2x2 after pooling => input spatial 4x4, 128 channels.
    x = jax.random.normal(keys[14], (2, 128, 4, 4), f32)          # NCHW, like PyTorch

    out = jax.block_until_ready(classifier_cnn_large(x, params))
    ref = jax.block_until_ready(reference(x, params))
    assert out.shape == (2, 10), out.shape
    # Tolerance sized for bf16 MXU operands (f32 accumulation) vs. an all-f32 reference.
    if not bool(jnp.allclose(out, ref, atol=2e-2, rtol=2e-2)):
        raise AssertionError(
            f"kernel/reference mismatch, max abs diff = {float(jnp.max(jnp.abs(out - ref)))}")
    print("KERNEL_OK")
</pallas_src>

<mosaic_0001>
module attributes {stable_mosaic.version = 11 : i64} {
  func.func @classifier_kernel(%arg0: i32, %arg1: memref<4x4x8x1152xbf16, #tpu.memory_space<vmem>>, %arg2: memref<1152x256xbf16, #tpu.memory_space<vmem>>, %arg3: memref<1x256xf32, #tpu.memory_space<vmem>>, %arg4: memref<256x256xbf16, #tpu.memory_space<vmem>>, %arg5: memref<1x256xf32, #tpu.memory_space<vmem>>, %arg6: memref<1x256xf32, #tpu.memory_space<vmem>>, %arg7: memref<1x256xf32, #tpu.memory_space<vmem>>, %arg8: memref<1024x10xbf16, #tpu.memory_space<vmem>>, %arg9: memref<1x10xf32, #tpu.memory_space<vmem>>, %arg10: memref<8x10xf32, #tpu.memory_space<vmem>>) attributes {dimension_semantics = [#tpu.dimension_semantics<parallel>], iteration_bounds = array<i64: 1>, scalar_prefetch = 0 : i64, scratch_operands = 0 : i64, tpu.core_type = #tpu.core_type<tc>, window_params = [{transform_indices = @transform_0, window_bounds = array<i64: 4, 4, 8, 1152>}, {pipeline_mode = #tpu.pipeline_mode<synchronous>, transform_indices = @transform_1, window_bounds = array<i64: 1152, 256>}, {pipeline_mode = #tpu.pipeline_mode<synchronous>, transform_indices = @transform_2, window_bounds = array<i64: 1, 256>}, {pipeline_mode = #tpu.pipeline_mode<synchronous>, transform_indices = @transform_3, window_bounds = array<i64: 256, 256>}, {pipeline_mode = #tpu.pipeline_mode<synchronous>, transform_indices = @transform_4, window_bounds = array<i64: 1, 256>}, {pipeline_mode = #tpu.pipeline_mode<synchronous>, transform_indices = @transform_5, window_bounds = array<i64: 1, 256>}, {pipeline_mode = #tpu.pipeline_mode<synchronous>, transform_indices = @transform_6, window_bounds = array<i64: 1, 256>}, {pipeline_mode = #tpu.pipeline_mode<synchronous>, transform_indices = @transform_7, window_bounds = array<i64: 1024, 10>}, {pipeline_mode = #tpu.pipeline_mode<synchronous>, transform_indices = @transform_8, window_bounds = array<i64: 1, 10>}, {transform_indices = @transform_9, window_bounds = array<i64: 8, 10>}]} {
    %c0 = arith.constant 0 : index
    %c0_0 = arith.constant 0 : index
    %c0_1 = arith.constant 0 : index
    %c0_2 = arith.constant 0 : index
    %0 = vector.load %arg1[%c0, %c0_0, %c0_1, %c0_2] : memref<4x4x8x1152xbf16, #tpu.memory_space<vmem>>, vector<4x4x8x1152xbf16>
    %1 = vector.shape_cast %0 : vector<4x4x8x1152xbf16> to vector<128x1152xbf16>
    %c0_3 = arith.constant 0 : index
    %c0_4 = arith.constant 0 : index
    %2 = vector.load %arg2[%c0_3, %c0_4] : memref<1152x256xbf16, #tpu.memory_space<vmem>>, vector<1152x256xbf16>
    %cst = arith.constant dense<0.000000e+00> : vector<128x256xf32>
    %3 = tpu.matmul %1, %2, %cst {dimension_numbers = #tpu.dot_dimension_numbers<[1], [0], [0], [1], [0, 0, 1, 1], [], []>} : vector<128x1152xbf16>, vector<1152x256xbf16>, vector<128x256xf32> -> vector<128x256xf32>
    %c0_5 = arith.constant 0 : index
    %c0_6 = arith.constant 0 : index
    %4 = vector.load %arg3[%c0_5, %c0_6] : memref<1x256xf32, #tpu.memory_space<vmem>>, vector<1x256xf32>
    %5 = vector.broadcast %4 : vector<1x256xf32> to vector<128x256xf32>
    %6 = arith.addf %3, %5 : vector<128x256xf32>
    %cst_7 = arith.constant 0.000000e+00 : f32
    %7 = vector.broadcast %cst_7 : f32 to vector<128x256xf32>
    %8 = arith.maximumf %6, %7 : vector<128x256xf32>
    %9 = arith.truncf %8 : vector<128x256xf32> to vector<128x256xbf16>
    %c0_8 = arith.constant 0 : index
    %c0_9 = arith.constant 0 : index
    %10 = vector.load %arg4[%c0_8, %c0_9] : memref<256x256xbf16, #tpu.memory_space<vmem>>, vector<256x256xbf16>
    %cst_10 = arith.constant dense<0.000000e+00> : vector<128x256xf32>
    %11 = tpu.matmul %9, %10, %cst_10 {dimension_numbers = #tpu.dot_dimension_numbers<[1], [0], [0], [1], [0, 0, 1, 1], [], []>} : vector<128x256xbf16>, vector<256x256xbf16>, vector<128x256xf32> -> vector<128x256xf32>
    %c0_11 = arith.constant 0 : index
    %c0_12 = arith.constant 0 : index
    %12 = vector.load %arg5[%c0_11, %c0_12] : memref<1x256xf32, #tpu.memory_space<vmem>>, vector<1x256xf32>
    %13 = vector.broadcast %12 : vector<1x256xf32> to vector<128x256xf32>
    %14 = arith.addf %11, %13 : vector<128x256xf32>
    %15 = vector.extract_strided_slice %14 {offsets = [0, 0], sizes = [32, 256], strides = [1, 1]} : vector<128x256xf32> to vector<32x256xf32>
    %16 = vector.extract_strided_slice %14 {offsets = [32, 0], sizes = [32, 256], strides = [1, 1]} : vector<128x256xf32> to vector<32x256xf32>
    %17 = arith.maximumf %15, %16 : vector<32x256xf32>
    %18 = vector.extract_strided_slice %14 {offsets = [64, 0], sizes = [32, 256], strides = [1, 1]} : vector<128x256xf32> to vector<32x256xf32>
    %19 = vector.extract_strided_slice %14 {offsets = [96, 0], sizes = [32, 256], strides = [1, 1]} : vector<128x256xf32> to vector<32x256xf32>
    %20 = arith.maximumf %18, %19 : vector<32x256xf32>
    %21 = arith.maximumf %17, %20 : vector<32x256xf32>
    %c0_13 = arith.constant 0 : index
    %c0_14 = arith.constant 0 : index
    %22 = vector.load %arg6[%c0_13, %c0_14] : memref<1x256xf32, #tpu.memory_space<vmem>>, vector<1x256xf32>
    %23 = vector.broadcast %22 : vector<1x256xf32> to vector<32x256xf32>
    %24 = arith.mulf %21, %23 : vector<32x256xf32>
    %c0_15 = arith.constant 0 : index
    %c0_16 = arith.constant 0 : index
    %25 = vector.load %arg7[%c0_15, %c0_16] : memref<1x256xf32, #tpu.memory_space<vmem>>, vector<1x256xf32>
    %26 = vector.broadcast %25 : vector<1x256xf32> to vector<32x256xf32>
    %27 = arith.addf %24, %26 : vector<32x256xf32>
    %cst_17 = arith.constant 0.000000e+00 : f32
    %28 = vector.broadcast %cst_17 : f32 to vector<32x256xf32>
    %29 = arith.maximumf %27, %28 : vector<32x256xf32>
    %30 = vector.extract_strided_slice %29 {offsets = [0, 0], sizes = [8, 256], strides = [1, 1]} : vector<32x256xf32> to vector<8x256xf32>
    %31 = vector.extract_strided_slice %29 {offsets = [8, 0], sizes = [8, 256], strides = [1, 1]} : vector<32x256xf32> to vector<8x256xf32>
    %32 = vector.extract_strided_slice %29 {offsets = [16, 0], sizes = [8, 256], strides = [1, 1]} : vector<32x256xf32> to vector<8x256xf32>
    %33 = vector.extract_strided_slice %29 {offsets = [24, 0], sizes = [8, 256], strides = [1, 1]} : vector<32x256xf32> to vector<8x256xf32>
    %34 = tpu.concatenate %30, %31, %32, %33 in 1 : vector<8x256xf32>, vector<8x256xf32>, vector<8x256xf32>, vector<8x256xf32> -> vector<8x1024xf32>
    %35 = arith.truncf %34 : vector<8x1024xf32> to vector<8x1024xbf16>
    %c0_18 = arith.constant 0 : index
    %c0_19 = arith.constant 0 : index
    %36 = vector.load %arg8[%c0_18, %c0_19] : memref<1024x10xbf16, #tpu.memory_space<vmem>>, vector<1024x10xbf16>
    %cst_20 = arith.constant dense<0.000000e+00> : vector<8x10xf32>
    %37 = tpu.matmul %35, %36, %cst_20 {dimension_numbers = #tpu.dot_dimension_numbers<[1], [0], [0], [1], [0, 0, 1, 1], [], []>} : vector<8x1024xbf16>, vector<1024x10xbf16>, vector<8x10xf32> -> vector<8x10xf32>
    %c0_21 = arith.constant 0 : index
    %c0_22 = arith.constant 0 : index
    %38 = vector.load %arg9[%c0_21, %c0_22] : memref<1x10xf32, #tpu.memory_space<vmem>>, vector<1x10xf32>
    %39 = vector.broadcast %38 : vector<1x10xf32> to vector<8x10xf32>
    %40 = arith.addf %37, %39 : vector<8x10xf32>
    %c0_23 = arith.constant 0 : index
    %c0_24 = arith.constant 0 : index
    %41 = vector.load %arg10[%c0_23, %c0_24] : memref<8x10xf32, #tpu.memory_space<vmem>>, vector<8x10xf32>
    tpu.vector_store %arg10[%c0_23, %c0_24], %40 {strides = array<i32>} : memref<8x10xf32, #tpu.memory_space<vmem>>, vector<8x10xf32>,
    return
  }
  func.func @transform_0(%arg0: i32) -> (i32, i32, i32, i32) {
    %c0_i32 = arith.constant 0 : i32
    %c0_i32_0 = arith.constant 0 : i32
    %c0_i32_1 = arith.constant 0 : i32
    %c0_i32_2 = arith.constant 0 : i32
    return %c0_i32, %c0_i32_0, %arg0, %c0_i32_1 : i32, i32, i32, i32
  }
  func.func @transform_1(%arg0: i32) -> (i32, i32) {
    %c0_i32 = arith.constant 0 : i32
    %c0_i32_0 = arith.constant 0 : i32
    %c0_i32_1 = arith.constant 0 : i32
    return %c0_i32, %c0_i32_0 : i32, i32
  }
  func.func @transform_2(%arg0: i32) -> (i32, i32) {
    %c0_i32 = arith.constant 0 : i32
    %c0_i32_0 = arith.constant 0 : i32
    %c0_i32_1 = arith.constant 0 : i32
    return %c0_i32, %c0_i32_0 : i32, i32
  }
  func.func @transform_3(%arg0: i32) -> (i32, i32) {
    %c0_i32 = arith.constant 0 : i32
    %c0_i32_0 = arith.constant 0 : i32
    %c0_i32_1 = arith.constant 0 : i32
    return %c0_i32, %c0_i32_0 : i32, i32
  }
  func.func @transform_4(%arg0: i32) -> (i32, i32) {
    %c0_i32 = arith.constant 0 : i32
    %c0_i32_0 = arith.constant 0 : i32
    %c0_i32_1 = arith.constant 0 : i32
    return %c0_i32, %c0_i32_0 : i32, i32
  }
  func.func @transform_5(%arg0: i32) -> (i32, i32) {
    %c0_i32 = arith.constant 0 : i32
    %c0_i32_0 = arith.constant 0 : i32
    %c0_i32_1 = arith.constant 0 : i32
    return %c0_i32, %c0_i32_0 : i32, i32
  }
  func.func @transform_6(%arg0: i32) -> (i32, i32) {
    %c0_i32 = arith.constant 0 : i32
    %c0_i32_0 = arith.constant 0 : i32
    %c0_i32_1 = arith.constant 0 : i32
    return %c0_i32, %c0_i32_0 : i32, i32
  }
  func.func @transform_7(%arg0: i32) -> (i32, i32) {
    %c0_i32 = arith.constant 0 : i32
    %c0_i32_0 = arith.constant 0 : i32
    %c0_i32_1 = arith.constant 0 : i32
    return %c0_i32, %c0_i32_0 : i32, i32
  }
  func.func @transform_8(%arg0: i32) -> (i32, i32) {
    %c0_i32 = arith.constant 0 : i32
    %c0_i32_0 = arith.constant 0 : i32
    %c0_i32_1 = arith.constant 0 : i32
    return %c0_i32, %c0_i32_0 : i32, i32
  }
  func.func @transform_9(%arg0: i32) -> (i32, i32) {
    %c0_i32 = arith.constant 0 : i32
    %c0_i32_0 = arith.constant 0 : i32
    return %arg0, %c0_i32 : i32, i32
  }
}

</mosaic_0001>

<bundles_post_ra>
// kernel: classifier_cnn_large.1
= control target key start
LH: loop header
LB: loop body
LE: loop exit
PB: predicated region body
PF: predicated region fallthrough
CT: control target
= control target key end

     0   :  { %14 = vsyncpa [#allocation3], 0  ;;  %s4831_s0 = inlined_call_operand.hbm [shape: bf16[4,4,8,1152], index: 0, kind: input, shape index: {}]   ;;  %s4832_s1 = inlined_call_operand.hbm [shape: bf16[1152,256], index: 1, kind: input, shape index: {}]   ;;  %s4833_s2 = inlined_call_operand.hbm [shape: f32[1,256], index: 2, kind: input, shape index: {}]   ;;  %s4834_s3 = inlined_call_operand.hbm [shape: bf16[256,256], index: 3, kind: input, shape index: {}]   ;;  %s4835_s4 = inlined_call_operand.hbm [shape: f32[1,256], index: 4, kind: input, shape index: {}]   ;;  %s4836_s5 = inlined_call_operand.hbm [shape: f32[1,256], index: 5, kind: input, shape index: {}]   ;;  %s4837_s6 = inlined_call_operand.hbm [shape: f32[1,256], index: 6, kind: input, shape index: {}]   ;;  %s4838_s7 = inlined_call_operand.hbm [shape: bf16[1024,10], index: 7, kind: input, shape index: {}]   ;;  %s4839_s8 = inlined_call_operand.hbm [shape: f32[1,10], index: 8, kind: input, shape index: {}]   ;;  %s4840_s9 = inlined_call_operand.hbm [shape: f32[8,10], index: 9, kind: output, shape index: {}]  }
   0x1   :  { %15 = vsyncpa [#allocation6], 0 }
   0x2   :  { %16 = vsyncpa [#allocation9], 0 }
   0x3   :  { %17 = vsyncpa [#allocation12], 0 }
   0x4   :  { %18 = vsyncpa [#allocation15], 0 }
   0x5   :  { %19 = vsyncpa [#allocation4], 0  ;;  %s4422_s30 = smov [#allocation5]   ;;  %s4190_s13 = scalar_lea.hbm %s4832_s1, 18432 }
   0x6   :  { %s37_s10 = sshll.u32 %s4422_s30, 4  ;;  %p4191_p0 = scmp.ne.s32.totalorder %s4832_s1, %s4190_s13  ;;  %s38_s10 = int_to_ptr.vmem [resolvable:$true] %s37_s10 }
   0x7   :  { %p4194_p1 = scmp.lt.u32.totalorder %s4190_s13, %s4832_s1 }
   0x9   :  { %p4196_p2 = pnand %p4194_p1, %p4191_p0 }
   0xb   :  { %4199 = shalt.err (!%p4196_p2)
}
   0xc   :  { %s4200_s18 = scalar_lea.vmem %s38_s10, 18432  ;;  %p4205_p4 = scmp.lt.s32.totalorder %s38_s10, %s38_s10 }
   0xd   :  { %p4201_p3 = scmp.ne.s32.totalorder %s38_s10, %s4200_s18  ;;  %p4206_p5 = scmp.lt.s32.totalorder %s4200_s18, %s4200_s18 }
   0xf   :  { %p4207_p6 = por %p4206_p5, %p4205_p4 }
  0x11   :  { %p4208_p7 = pnand %p4207_p6, %p4201_p3 }
  0x13   :  { %4211 = shalt.err (!%p4208_p7)
}
  0x14   :  { %s4423_s19 = smov 128   ;;  %s4424_s20 = smov 8  }
  0x15   :  { %43 = dma.hbm_to_vmem [thread:$0]  %s4832_s1, 18432, %s38_s10, [#allocation6], %s4423_s19, %s4423_s19, %s4424_s20  }
  0x16   :  { %s4425_s23 = smov [#allocation8]   ;;  %s4426_s25 = smov [#allocation11]  }
  0x17   :  { %s59_s24 = sshll.u32 %s4425_s23, 4  ;;  %s82_s26 = sshll.u32 %s4426_s25, 4  ;;  %s60_s24 = int_to_ptr.vmem [resolvable:$true] %s59_s24  ;;  %s83_s26 = int_to_ptr.vmem [resolvable:$true] %s82_s26 }
  0x18   :  { %s4212_s29 = scalar_lea.hbm %s4834_s3, 4096 }
  0x19   :  { %p4213_p8 = scmp.ne.s32.totalorder %s4834_s3, %s4212_s29  ;;  %p4216_p9 = scmp.lt.u32.totalorder %s4212_s29, %s4834_s3 }
  0x1b   :  { %p4218_p10 = pnand %p4216_p9, %p4213_p8 }
  0x1d   :  { %4221 = shalt.err (!%p4218_p10)
}
  0x1e   :  { %s4222_s1 = scalar_lea.vmem %s60_s24, 4096  ;;  %p4227_p12 = scmp.lt.s32.totalorder %s60_s24, %s60_s24 }
  0x1f   :  { %p4223_p11 = scmp.ne.s32.totalorder %s60_s24, %s4222_s1  ;;  %p4228_p13 = scmp.lt.s32.totalorder %s4222_s1, %s4222_s1 }
  0x21   :  { %p4229_p0 = por %p4228_p13, %p4227_p12 }
  0x23   :  { %p4230_p1 = pnand %p4229_p0, %p4223_p11 }
  0x25   :  { %4233 = shalt.err (!%p4230_p1)
}
  0x26   :  { %65 = dma.hbm_to_vmem [thread:$0]  %s4834_s3, 4096, %s60_s24, [#allocation9], %s4423_s19, %s4423_s19, %s4424_s20  }
  0x27   :  { %s4234_s17 = scalar_lea.hbm %s4836_s5, 32 }
  0x28   :  { %p4235_p2 = scmp.ne.s32.totalorder %s4836_s5, %s4234_s17  ;;  %p4238_p3 = scmp.lt.u32.totalorder %s4234_s17, %s4836_s5 }
  0x2a   :  { %p4240_p4 = pnand %p4238_p3, %p4235_p2 }
  0x2c   :  { %4243 = shalt.err (!%p4240_p4)
}
  0x2d   :  { %s4244_s25 = scalar_lea.vmem %s83_s26, 32  ;;  %p4249_p6 = scmp.lt.s32.totalorder %s83_s26, %s83_s26 }
  0x2e   :  { %p4245_p5 = scmp.ne.s32.totalorder %s83_s26, %s4244_s25  ;;  %p4250_p7 = scmp.lt.s32.totalorder %s4244_s25, %s4244_s25 }
  0x30   :  { %p4251_p8 = por %p4250_p7, %p4249_p6 }
  0x32   :  { %p4252_p9 = pnand %p4251_p8, %p4245_p5 }
  0x34   :  { %4255 = shalt.err (!%p4252_p9)
}
  0x35   :  { %85 = dma.hbm_to_vmem [thread:$0]  %s4836_s5, 32, %s83_s26, [#allocation12]  }
  0x36   :  { %s4427_s20 = smov [#allocation14]   ;;  %s4256_s29 = scalar_lea.hbm %s4838_s7, 8192 }
  0x37   :  { %s101_s24 = sshll.u32 %s4427_s20, 4  ;;  %p4257_p10 = scmp.ne.s32.totalorder %s4838_s7, %s4256_s29  ;;  %s102_s24 = int_to_ptr.vmem [resolvable:$true] %s101_s24 }
  0x38   :  { %p4260_p11 = scmp.lt.u32.totalorder %s4256_s29, %s4838_s7 }
  0x3a   :  { %p4262_p12 = pnand %p4260_p11, %p4257_p10 }
  0x3c   :  { %4265 = shalt.err (!%p4262_p12)
}
  0x3d   :  { %s4266_s1 = scalar_lea.vmem %s102_s24, 8192  ;;  %p4271_p0 = scmp.lt.s32.totalorder %s102_s24, %s102_s24 }
  0x3e   :  { %p4267_p13 = scmp.ne.s32.totalorder %s102_s24, %s4266_s1  ;;  %p4272_p1 = scmp.lt.s32.totalorder %s4266_s1, %s4266_s1 }
  0x40   :  { %p4273_p2 = por %p4272_p1, %p4271_p0 }
  0x42   :  { %p4274_p3 = pnand %p4273_p2, %p4267_p13 }
  0x44   :  { %4277 = shalt.err (!%p4274_p3)
}
  0x45   :  { %s4428_s5 = smov 64   ;;  %s4429_s26 = smov 4  }
  0x46   :  { %107 = dma.hbm_to_vmem [thread:$0]  %s4838_s7, 8192, %s102_s24, [#allocation15], %s4428_s5, %s4428_s5, %s4429_s26  }
  0x47   :  { %s4430_s15 = smov [#allocation2]   ;;  %s4278_s21 = scalar_lea.hbm %s4831_s0, 9216 }
  0x48   :  { %s25_s16 = sshll.u32 %s4430_s15, 4  ;;  %p4279_p4 = scmp.ne.s32.totalorder %s4831_s0, %s4278_s21  ;;  %s26_s16 = int_to_ptr.vmem [resolvable:$true] %s25_s16 }
  0x49   :  { %p4282_p5 = scmp.lt.u32.totalorder %s4278_s21, %s4831_s0 }
  0x4b   :  { %p4284_p6 = pnand %p4282_p5, %p4279_p4 }
  0x4d   :  { %4287 = shalt.err (!%p4284_p6)
}
  0x4e   :  { %s4288_s19 = scalar_lea.vmem %s26_s16, 9216  ;;  %p4293_p8 = scmp.lt.s32.totalorder %s26_s16, %s26_s16 }
  0x4f   :  { %p4289_p7 = scmp.ne.s32.totalorder %s26_s16, %s4288_s19  ;;  %p4294_p9 = scmp.lt.s32.totalorder %s4288_s19, %s4288_s19 }
  0x51   :  { %p4295_p10 = por %p4294_p9, %p4293_p8 }
  0x53   :  { %p4296_p11 = pnand %p4295_p10, %p4289_p7 }
  0x55   :  { %4299 = shalt.err (!%p4296_p11)
}
  0x56   :  { %s4431_s7 = smov 576   ;;  %s4432_s20 = smov 36  }
  0x57   :  { %31 = dma.hbm_to_vmem [thread:$0]  %s4831_s0, 9216, %s26_s16, [#allocation3], %s4431_s7, %s4431_s7, %s4432_s20  }
  0x58   :  { %s4433_s28 = smov [#allocation7]   ;;  %s4434_s30 = smov [#allocation10]  }
  0x59   :  { %s50_s29 = sshll.u32 %s4433_s28, 4  ;;  %s72_s11 = sshll.u32 %s4434_s30, 4  ;;  %s51_s29 = int_to_ptr.vmem [resolvable:$true] %s50_s29  ;;  %s73_s11 = int_to_ptr.vmem [resolvable:$true] %s72_s11 }
  0x5a   :  { %s4300_s1 = scalar_lea.hbm %s4833_s2, 32 }
  0x5b   :  { %p4301_p12 = scmp.ne.s32.totalorder %s4833_s2, %s4300_s1  ;;  %p4304_p13 = scmp.lt.u32.totalorder %s4300_s1, %s4833_s2 }
  0x5d   :  { %p4306_p0 = pnand %p4304_p13, %p4301_p12 }
  0x5f   :  { %4309 = shalt.err (!%p4306_p0)
}
  0x60   :  { %s4310_s0 = scalar_lea.vmem %s51_s29, 32  ;;  %p4315_p2 = scmp.lt.s32.totalorder %s51_s29, %s51_s29 }
  0x61   :  { %p4311_p1 = scmp.ne.s32.totalorder %s51_s29, %s4310_s0  ;;  %p4316_p3 = scmp.lt.s32.totalorder %s4310_s0, %s4310_s0 }
  0x63   :  { %p4317_p4 = por %p4316_p3, %p4315_p2 }
  0x65   :  { %p4318_p5 = pnand %p4317_p4, %p4311_p1 }
  0x67   :  { %4321 = shalt.err (!%p4318_p5)
}
  0x68   :  { %53 = dma.hbm_to_vmem [thread:$0]  %s4833_s2, 32, %s51_s29, [#allocation6]  }
  0x69   :  { %s4322_s21 = scalar_lea.hbm %s4835_s4, 32 }
  0x6a   :  { %p4323_p6 = scmp.ne.s32.totalorder %s4835_s4, %s4322_s21  ;;  %p4326_p7 = scmp.lt.u32.totalorder %s4322_s21, %s4835_s4 }
  0x6c   :  { %p4328_p8 = pnand %p4326_p7, %p4323_p6 }
  0x6e   :  { %4331 = shalt.err (!%p4328_p8)
}
  0x6f   :  { %s4332_s19 = scalar_lea.vmem %s73_s11, 32  ;;  %p4337_p10 = scmp.lt.s32.totalorder %s73_s11, %s73_s11 }
  0x70   :  { %p4333_p9 = scmp.ne.s32.totalorder %s73_s11, %s4332_s19  ;;  %p4338_p11 = scmp.lt.s32.totalorder %s4332_s19, %s4332_s19 }
  0x72   :  { %p4339_p12 = por %p4338_p11, %p4337_p10 }
  0x74   :  { %p4340_p13 = pnand %p4339_p12, %p4333_p9 }
  0x76   :  { %4343 = shalt.err (!%p4340_p13)
}
  0x77   :  { %75 = dma.hbm_to_vmem [thread:$0]  %s4835_s4, 32, %s73_s11, [#allocation9]  }
  0x78   :  { %s4435_s20 = smov [#allocation13]   ;;  %s4436_s27 = smov [#allocation16]  }
  0x79   :  { %s92_s24 = sshll.u32 %s4435_s20, 4  ;;  %s114_s28 = sshll.u32 %s4436_s27, 4  ;;  %s93_s24 = int_to_ptr.vmem [resolvable:$true] %s92_s24  ;;  %s115_s28 = int_to_ptr.vmem [resolvable:$true] %s114_s28 }
  0x7a   :  { %s4344_s12 = scalar_lea.hbm %s4837_s6, 32 }
  0x7b   :  { %p4345_p0 = scmp.ne.s32.totalorder %s4837_s6, %s4344_s12  ;;  %p4348_p1 = scmp.lt.u32.totalorder %s4344_s12, %s4837_s6 }
  0x7d   :  { %p4350_p2 = pnand %p4348_p1, %p4345_p0 }
  0x7f   :  { %4353 = shalt.err (!%p4350_p2)
}
  0x80   :  { %s4354_s4 = scalar_lea.vmem %s93_s24, 32  ;;  %p4359_p4 = scmp.lt.s32.totalorder %s93_s24, %s93_s24 }
  0x81   :  { %p4355_p3 = scmp.ne.s32.totalorder %s93_s24, %s4354_s4  ;;  %p4360_p5 = scmp.lt.s32.totalorder %s4354_s4, %s4354_s4 }
  0x83   :  { %p4361_p6 = por %p4360_p5, %p4359_p4 }
  0x85   :  { %p4362_p7 = pnand %p4361_p6, %p4355_p3 }
  0x87   :  { %4365 = shalt.err (!%p4362_p7)
}
  0x88   :  { %95 = dma.hbm_to_vmem [thread:$0]  %s4837_s6, 32, %s93_s24, [#allocation12]  }
  0x89   :  { %s4366_s15 = scalar_lea.hbm %s4839_s8, 16 }
  0x8a   :  { %p4367_p8 = scmp.ne.s32.totalorder %s4839_s8, %s4366_s15  ;;  %p4370_p9 = scmp.lt.u32.totalorder %s4366_s15, %s4839_s8 }
  0x8c   :  { %p4372_p10 = pnand %p4370_p9, %p4367_p8 }
  0x8e   :  { %4375 = shalt.err (!%p4372_p10)
}
  0x8f   :  { %s4376_s22 = scalar_lea.vmem %s115_s28, 16  ;;  %s4380_s23 = scalar_lea.vmem %s115_s28, 32 }
  0x90   :  { %p4377_p11 = scmp.ne.s32.totalorder %s115_s28, %s4376_s22  ;;  %p4381_p12 = scmp.lt.s32.totalorder %s115_s28, %s115_s28 }
  0x91   :  { %p4382_p13 = scmp.lt.s32.totalorder %s4380_s23, %s4376_s22 }
  0x93   :  { %p4383_p0 = por %p4382_p13, %p4381_p12 }
  0x95   :  { %p4384_p1 = pnand %p4383_p0, %p4377_p11 }
  0x97   :  { %4387 = shalt.err (!%p4384_p1)
}
  0x98   :  { %117 = dma.hbm_to_vmem [thread:$0]  %s4839_s8, 16, %s115_s28, [#allocation15]  }
  0x99   :  { %4410 = dma.done.wait [#allocation3], 9216  }
  0x9a   :  { %4411 = vsyncadd [#allocation3], 4294958080 }
  0x9b   :  { %4412 = dma.done.wait [#allocation6], 18464  }
  0x9c   :  { %4413 = vsyncadd [#allocation6], 4294948832 }
  0x9d   :  { %4414 = dma.done.wait [#allocation9], 4128  }
  0x9e   :  { %4415 = vsyncadd [#allocation9], 4294963168 }
  0x9f   :  { %4416 = dma.done.wait [#allocation12], 64  }
  0xa0   :  { %4417 = vsyncadd [#allocation12], 4294967232 }
  0xa1   :  { %4418 = dma.done.wait [#allocation15], 8208  }
  0xa2   :  { %4419 = vsyncadd [#allocation15], 4294959088  ;;  %v3758_v0 = vld [vmem:[#allocation5 + $0x104] ss:$8 sps:$4 sm:$0xff]   ;;  %v3760_v1 = vld [vmem:[#allocation5 + $0x100] ss:$8 sps:$4 sm:$0xff]  }
  0xa3   :  { %1583 = vmatprep.subr.bf16.mxu0 %v3758_v0  ;;  %v3761_v2 = vld [vmem:[#allocation5 + $0x114] ss:$8 sps:$4 sm:$0xff]   ;;  %v3763_v3 = vld [vmem:[#allocation5 + $0x110] ss:$8 sps:$4 sm:$0xff]   ;;  %v3764_v4 = vld [vmem:[#allocation5 + $0x124] ss:$8 sps:$4 sm:$0xff]  }
  0xa4   :  { %1584 = vmatpush1.bf16.msra.mxu0 %v3760_v1  ;;  %v3766_v5 = vld [vmem:[#allocation5 + $0x120] ss:$8 sps:$4 sm:$0xff]   ;;  %v3767_v6 = vld [vmem:[#allocation5 + $0x134] ss:$8 sps:$4 sm:$0xff]   ;;  %v3769_v7 = vld [vmem:[#allocation5 + $0x130] ss:$8 sps:$4 sm:$0xff]  }
  0xa5   :  { %1585 = vmatprep.subr.bf16.mxu0 %v3761_v2  ;;  %v3770_v8 = vld [vmem:[#allocation5 + $0x144] ss:$8 sps:$4 sm:$0xff]   ;;  %v3772_v9 = vld [vmem:[#allocation5 + $0x140] ss:$8 sps:$4 sm:$0xff]   ;;  %v3773_v10 = vld [vmem:[#allocation5 + $0x154] ss:$8 sps:$4 sm:$0xff]  }
  0xa6   :  { %v3775_v11 = vld [vmem:[#allocation5 + $0x150] ss:$8 sps:$4 sm:$0xff]   ;;  %v3776_v12 = vld [vmem:[#allocation5 + $0x164] ss:$8 sps:$4 sm:$0xff]   ;;  %v3778_v14 = vld [vmem:[#allocation5 + $0x160] ss:$8 sps:$4 sm:$0xff]  }
  0xa7   :  { %v3808_v13 = vld [vmem:[#allocation2 + $0xc] ss:$36 sps:$4 sm:$0xff]   ;;  %v3779_v15 = vld [vmem:[#allocation5 + $0x174] ss:$8 sps:$4 sm:$0xff]   ;;  %v3784_v18 = vld [vmem:[#allocation5 + $0x180] ss:$8 sps:$4 sm:$0xff]  }
  0xa8   :  { %1586 = vmatpush1.bf16.msra.mxu0 %v3763_v3  ;;  %1615 = vmatprep.mubr.bf16.mxu0 %v3808_v13  ;;  %v3781_v16 = vld [vmem:[#allocation5 + $0x170] ss:$8 sps:$4 sm:$0xff]   ;;  %v3782_v17 = vld [vmem:[#allocation5 + $0x184] ss:$8 sps:$4 sm:$0xff]   ;;  %v3785_v19 = vld [vmem:[#allocation5 + $0x194] ss:$8 sps:$4 sm:$0xff]  }
  0xa9   :  { %1587 = vmatprep.subr.bf16.mxu0 %v3764_v4  ;;  %v3787_v20 = vld [vmem:[#allocation5 + $0x190] ss:$8 sps:$4 sm:$0xff]   ;;  %v3788_v21 = vld [vmem:[#allocation5 + $0x1a4] ss:$8 sps:$4 sm:$0xff]   ;;  %v3790_v22 = vld [vmem:[#allocation5 + $0x1a0] ss:$8 sps:$4 sm:$0xff]  }
  0xaa   :  { %v3791_v23 = vld [vmem:[#allocation5 + $0x1b4] ss:$8 sps:$4 sm:$0xff]   ;;  %v3793_v24 = vld [vmem:[#allocation5 + $0x1b0] ss:$8 sps:$4 sm:$0xff]   ;;  %v3794_v25 = vld [vmem:[#allocation5 + $0x1c4] ss:$8 sps:$4 sm:$0xff]  }
  0xab   :  { %v3796_v26 = vld [vmem:[#allocation5 + $0x1c0] ss:$8 sps:$4 sm:$0xff]   ;;  %v3797_v27 = vld [vmem:[#allocation5 + $0x1d4] ss:$8 sps:$4 sm:$0xff]   ;;  %v3799_v28 = vld [vmem:[#allocation5 + $0x1d0] ss:$8 sps:$4 sm:$0xff]  }
  0xac   :  { %1588 = vmatpush1.bf16.msra.mxu0 %v3766_v5  ;;  %v3800_v29 = vld [vmem:[#allocation5 + $0x1e4] ss:$8 sps:$4 sm:$0xff]   ;;  %v3802_v30 = vld [vmem:[#allocation5 + $0x1e0] ss:$8 sps:$4 sm:$0xff]   ;;  %v3803_v31 = vld [vmem:[#allocation5 + $0x1f4] ss:$8 sps:$4 sm:$0xff]  }
  0xad   :  { %1589 = vmatprep.subr.bf16.mxu0 %v3767_v6  ;;  %v3805_v32 = vld [vmem:[#allocation5 + $0x1f0] ss:$8 sps:$4 sm:$0xff]   ;;  %v3811_v33 = vld [vmem:[#allocation5 + $0x204] ss:$8 sps:$4 sm:$0xff]   ;;  %v3809_v35 = vld [vmem:[#allocation5 + $0x200] ss:$8 sps:$4 sm:$0xff]  }
  0xae   :  { %v3806_v34 = vld [vmem:[#allocation2 + $0x8] ss:$36 sps:$4 sm:$0xff]   ;;  %v3815_v36 = vld [vmem:[#allocation2 + $0x54] ss:$36 sps:$4 sm:$0xff]   ;;  %v3824_v42 = vld [vmem:[#allocation2 + $0x9c] ss:$36 sps:$4 sm:$0xff]  }
  0xaf   :  { %v3814_v37 = vld [vmem:[#allocation5 + $0x214] ss:$8 sps:$4 sm:$0xff]   ;;  %v3812_v38 = vld [vmem:[#allocation5 + $0x210] ss:$8 sps:$4 sm:$0xff]   ;;  %v3820_v39 = vld [vmem:[#allocation5 + $0x224] ss:$8 sps:$4 sm:$0xff]  }
  0xb0   :  { %1590 = vmatpush1.bf16.msra.mxu0 %v3769_v7  ;;  %v3817_v40 = vld [vmem:[#allocation2 + $0x50] ss:$36 sps:$4 sm:$0xff]   ;;  %v3818_v41 = vld [vmem:[#allocation5 + $0x220] ss:$8 sps:$4 sm:$0xff]   ;;  %v3829_v45 = vld [vmem:[#allocation5 + $0x244] ss:$8 sps:$4 sm:$0xff]  }
  0xb1   :  { %1591 = vmatprep.subr.bf16.mxu0 %v3770_v8  ;;  %v3823_v43 = vld [vmem:[#allocation5 + $0x234] ss:$8 sps:$4 sm:$0xff]   ;;  %v3821_v44 = vld [vmem:[#allocation5 + $0x230] ss:$8 sps:$4 sm:$0xff]   ;;  %v3827_v47 = vld [vmem:[#allocation5 + $0x240] ss:$8 sps:$4 sm:$0xff]  }
  0xb2   :  { %v3826_v46 = vld [vmem:[#allocation2 + $0x98] ss:$36 sps:$4 sm:$0xff]   ;;  %v3833_v48 = vld [vmem:[#allocation2 + $0xe4] ss:$36 sps:$4 sm:$0xff]   ;;  %v3842_v57 = vld [vmem:[#allocation2 + $0x12c] ss:$36 sps:$4 sm:$0xff]  }
  0xb3   :  { %v3832_v49 = vld [vmem:[#allocation5 + $0x254] ss:$8 sps:$4 sm:$0xff]   ;;  %v3830_v50 = vld [vmem:[#allocation5 + $0x250] ss:$8 sps:$4 sm:$0xff]   ;;  %v3838_v51 = vld [vmem:[#allocation5 + $0x264] ss:$8 sps:$4 sm:$0xff]  }
  0xb4   :  { %1592 = vmatpush1.bf16.msra.mxu0 %v3772_v9  ;;  %v3947_v52 = vld [vmem:[#allocation5 + $0x4] ss:$8 sps:$4 sm:$0xff]   ;;  %v3836_v54 = vld [vmem:[#allocation5 + $0x260] ss:$8 sps:$4 sm:$0xff]   ;;  %v3841_v56 = vld [vmem:[#allocation5 + $0x274] ss:$8 sps:$4 sm:$0xff]  }
  0xb5   :  { %1593 = vmatprep.subr.bf16.mxu0 %v3773_v10  ;;  %v3835_v53 = vld [vmem:[#allocation2 + $0xe0] ss:$36 sps:$4 sm:$0xff]   ;;  %1470 = vmatprep.subr.bf16.mxu1 %v3947_v52  ;;  %v3956_v58 = vld [vmem:[#allocation5 + $0x14] ss:$8 sps:$4 sm:$0xff]   ;;  %v3839_v59 = vld [vmem:[#allocation5 + $0x270] ss:$8 sps:$4 sm:$0xff]  }
  0xb6   :  { %v3952_v55 = vld [vmem:[#allocation5] ss:$8 sps:$4 sm:$0xff]   ;;  %v3961_v60 = vld [vmem:[#allocation5 + $0x10] ss:$8 sps:$4 sm:$0xff]   ;;  %v3847_v61 = vld [vmem:[#allocation5 + $0x284] ss:$8 sps:$4 sm:$0xff]  }
  0xb7   :  { %1471 = vmatpush1.bf16.msra.mxu1 %v3952_v55  ;;  %v3962_v62 = vld [vmem:[#allocation5 + $0x24] ss:$8 sps:$4 sm:$0xff]   ;;  %v3964_v63 = vld [vmem:[#allocation5 + $0x20] ss:$8 sps:$4 sm:$0xff]   ;;  %v3967_v0 = vld [vmem:[#allocation5 + $0x34] ss:$8 sps:$4 sm:$0xff]  }
  0xb8   :  { %1594 = vmatpush1.bf16.msra.mxu0 %v3775_v11  ;;  %1472 = vmatprep.subr.bf16.mxu1 %v3956_v58  ;;  %v3844_v1 = vld [vmem:[#allocation2 + $0x128] ss:$36 sps:$4 sm:$0xff]   ;;  %v3850_v3 = vld [vmem:[#allocation5 + $0x294] ss:$8 sps:$4 sm:$0xff]   ;;  %v3973_v5 = vld [vmem:[#allocation5 + $0x30] ss:$8 sps:$4 sm:$0xff]  }
  0xb9   :  { %1595 = vmatprep.subr.bf16.mxu0 %v3776_v12  ;;  %v3845_v2 = vld [vmem:[#allocation5 + $0x280] ss:$8 sps:$4 sm:$0xff]   ;;  %v3851_v4 = vld [vmem:[#allocation2 + $0x174] ss:$36 sps:$4 sm:$0xff]   ;;  %v3974_v6 = vld [vmem:[#allocation5 + $0x44] ss:$8 sps:$4 sm:$0xff]  }
  0xba   :  { %v3848_v7 = vld [vmem:[#allocation5 + $0x290] ss:$8 sps:$4 sm:$0xff]   ;;  %v3856_v8 = vld [vmem:[#allocation5 + $0x2a4] ss:$8 sps:$4 sm:$0xff]   ;;  %v3976_v9 = vld [vmem:[#allocation5 + $0x40] ss:$8 sps:$4 sm:$0xff]  }
  0xbb   :  { %1473 = vmatpush1.bf16.msra.mxu1 %v3961_v60  ;;  %v3979_v10 = vld [vmem:[#allocation5 + $0x54] ss:$8 sps:$4 sm:$0xff]   ;;  %v3854_v12 = vld [vmem:[#allocation5 + $0x2a0] ss:$8 sps:$4 sm:$0xff]   ;;  %v3893_v58 = vld [vmem:[#allocation5 + $0x330] ss:$8 sps:$4 sm:$0xff]  }
  0xbc   :  { %1596 = vmatpush1.bf16.msra.mxu0 %v3778_v14  ;;  %1474 = vmatprep.subr.bf16.mxu1 %v3962_v62  ;;  %v3853_v11 = vld [vmem:[#allocation2 + $0x170] ss:$36 sps:$4 sm:$0xff]   ;;  %v3860_v13 = vld [vmem:[#allocation2 + $0x1bc] ss:$36 sps:$4 sm:$0xff]   ;;  %s4438_s8 = smov [#allocation17]   ;;  %vm3159_vm0 = vcmask 80896  }
  0xbd   :  { %1597 = vmatprep.subr.bf16.mxu0 %v3779_v15  ;;  %v3859_v14 = vld [vmem:[#allocation5 + $0x2b4] ss:$8 sps:$4 sm:$0xff]   ;;  %v3985_v15 = vld [vmem:[#allocation5 + $0x50] ss:$8 sps:$4 sm:$0xff]   ;;  %v4036_v60 = vld [vmem:[#allocation5 + $0xe0] ss:$8 sps:$4 sm:$0xff]  }
  0xbe   :  { %v4027_v52 = vld [vmem:[#allocation5 + $0xd4] ss:$8 sps:$4 sm:$0xff]   ;;  %v3898_v62 = vld [vmem:[#allocation2 + $0xa0] ss:$36 sps:$4 sm:$0xff]   ;;  %s3167_s3 = sshll.u32 %s4438_s8, 4  ;;  %s3168_s3 = int_to_ptr.vmem [resolvable:$true] %s3167_s3 }
  0xbf   :  { %1475 = vmatpush1.bf16.msra.mxu1 %v3964_v63  ;;  %v3895_v55 = vld [vmem:[#allocation5 + $0x334] ss:$8 sps:$4 sm:$0xff]   ;;  %v3899_v63 = vld [vmem:[#allocation5 + $0x340] ss:$8 sps:$4 sm:$0xff]   ;;  %s4388_s19 = scalar_lea.vmem %s3168_s3, 128  ;;  %p4393_p3 = scmp.lt.s32.totalorder %s3168_s3, %s3168_s3 }
  0xc0   :  { %1598 = vmatpush1.bf16.msra.mxu0 %v3781_v16  ;;  %1476 = vmatprep.subr.bf16.mxu1 %v3967_v0  ;;  %v3986_v16 = vld [vmem:[#allocation5 + $0x64] ss:$8 sps:$4 sm:$0xff]   ;;  %p4389_p2 = scmp.ne.s32.totalorder %s3168_s3, %s4388_s19  ;;  %p4394_p4 = scmp.lt.s32.totalorder %s4388_s19, %s4388_s19 }
  0xc1   :  { %1599 = vmatprep.subr.bf16.mxu0 %v3782_v17  ;;  %v3857_v17 = vld [vmem:[#allocation5 + $0x2b0] ss:$8 sps:$4 sm:$0xff]  }
  0xc2   :  { %v3905_v0 = vld [vmem:[#allocation2 + $0xec] ss:$36 sps:$4 sm:$0xff]   ;;  %p4395_p5 = por %p4394_p4, %p4393_p3 }
  0xc3   :  { %1477 = vmatpush1.bf16.msra.mxu1 %v3973_v5  ;;  %v4046_v5 = vld [vmem:[#allocation2] ss:$36 sps:$4 sm:$0xff]  }
  0xc4   :  { %1600 = vmatpush1.bf16.msra.mxu0 %v3784_v18  ;;  %1478 = vmatprep.subr.bf16.mxu1 %v3974_v6  ;;  %v3865_v18 = vld [vmem:[#allocation5 + $0x2c4] ss:$8 sps:$4 sm:$0xff]   ;;  %p4396_p6 = pnand %p4395_p5, %p4389_p2 }
  0xc5   :  { %1601 = vmatprep.subr.bf16.mxu0 %v3785_v19  ;;  %v3988_v19 = vld [vmem:[#allocation5 + $0x60] ss:$8 sps:$4 sm:$0xff]   ;;  %v4050_v6 = vld [vmem:[#allocation2 + $0x4c] ss:$36 sps:$4 sm:$0xff]  }
  0xc7   :  { %1479 = vmatpush1.bf16.msra.mxu1 %v3976_v9  ;;  %v3914_v9 = vld [vmem:[#allocation2 + $0x134] ss:$36 sps:$4 sm:$0xff]  }
  0xc8   :  { %1602 = vmatpush1.bf16.msra.mxu0 %v3787_v20  ;;  %1480 = vmatprep.subr.bf16.mxu1 %v3979_v10  ;;  %v3991_v20 = vld [vmem:[#allocation5 + $0x74] ss:$8 sps:$4 sm:$0xff]  }
  0xc9   :  { %1603 = vmatprep.subr.bf16.mxu0 %v3788_v21  ;;  %v3862_v21 = vld [vmem:[#allocation2 + $0x1b8] ss:$36 sps:$4 sm:$0xff]  }
  0xca   :  { %v3913_v10 = vld [vmem:[#allocation5 + $0x374] ss:$8 sps:$4 sm:$0xff]  }
  0xcb   :  { %1481 = vmatpush1.bf16.msra.mxu1 %v3985_v15  ;;  %v3916_v15 = vld [vmem:[#allocation2 + $0x130] ss:$36 sps:$4 sm:$0xff]  }
  0xcc   :  { %1604 = vmatpush1.bf16.msra.mxu0 %v3790_v22  ;;  %1482 = vmatprep.subr.bf16.mxu1 %v3986_v16  ;;  %v3863_v22 = vld [vmem:[#allocation5 + $0x2c0] ss:$8 sps:$4 sm:$0xff]  }
  0xcd   :  { %1605 = vmatprep.subr.bf16.mxu0 %v3791_v23  ;;  %v3868_v23 = vld [vmem:[#allocation5 + $0x2d4] ss:$8 sps:$4 sm:$0xff]   ;;  %v3917_v16 = vld [vmem:[#allocation5 + $0x380] ss:$8 sps:$4 sm:$0xff]  }
  0xcf   :  { %1483 = vmatpush1.bf16.msra.mxu1 %v3988_v19  ;;  %v3920_v19 = vld [vmem:[#allocation5 + $0x390] ss:$8 sps:$4 sm:$0xff]  }
  0xd0   :  { %1606 = vmatpush1.bf16.msra.mxu0 %v3793_v24  ;;  %v3869_v24 = vld [vmem:[#allocation2 + $0x204] ss:$36 sps:$4 sm:$0xff]   ;;  %1484 = vmatprep.subr.bf16.mxu1 %v3991_v20 }
  0xd1   :  { %1607 = vmatprep.subr.bf16.mxu0 %v3794_v25  ;;  %v3997_v25 = vld [vmem:[#allocation5 + $0x70] ss:$8 sps:$4 sm:$0xff]   ;;  %v3928_v20 = vld [vmem:[#allocation5 + $0x3a4] ss:$8 sps:$4 sm:$0xff]  }
  0xd3   :  { %1485 = vmatpush1.bf16.msra.mxu1 %v3997_v25  ;;  %v3932_v25 = vld [vmem:[#allocation2 + $0x1c4] ss:$36 sps:$4 sm:$0xff]  }
  0xd4   :  { %1608 = vmatpush1.bf16.msra.mxu0 %v3796_v26  ;;  %v3998_v26 = vld [vmem:[#allocation5 + $0x84] ss:$8 sps:$4 sm:$0xff]  }
  0xd5   :  { %1609 = vmatprep.subr.bf16.mxu0 %v3797_v27  ;;  %v3866_v27 = vld [vmem:[#allocation5 + $0x2d0] ss:$8 sps:$4 sm:$0xff]   ;;  %1486 = vmatprep.subr.bf16.mxu1 %v3998_v26  ;;  %v3931_v26 = vld [vmem:[#allocation5 + $0x3b4] ss:$8 sps:$4 sm:$0xff]  }
  0xd8   :  { %1610 = vmatpush1.bf16.msra.mxu0 %v3799_v28  ;;  %v3874_v28 = vld [vmem:[#allocation5 + $0x2e4] ss:$8 sps:$4 sm:$0xff]  }
  0xd9   :  { %1611 = vmatprep.subr.bf16.mxu0 %v3800_v29  ;;  %v4000_v29 = vld [vmem:[#allocation5 + $0x80] ss:$8 sps:$4 sm:$0xff]  }
  0xda   :  { %1487 = vmatpush1.bf16.msra.mxu1 %v4000_v29  ;;  %v4060_v29 = vld [vmem:[#allocation2 + $0xd8] ss:$36 sps:$4 sm:$0xff]  }
  0xdc   :  { %1612 = vmatpush1.bf16.msra.mxu0 %v3802_v30  ;;  %v4003_v30 = vld [vmem:[#allocation5 + $0x94] ss:$8 sps:$4 sm:$0xff]  }
  0xdd   :  { %1613 = vmatprep.subr.bf16.mxu0 %v3803_v31  ;;  %v3871_v31 = vld [vmem:[#allocation2 + $0x200] ss:$36 sps:$4 sm:$0xff]   ;;  %1488 = vmatprep.subr.bf16.mxu1 %v4003_v30 }
  0xde   :  { %v4062_v30 = vld [vmem:[#allocation2 + $0x124] ss:$36 sps:$4 sm:$0xff]  }
  0xe0   :  { %1614 = vmatpush1.bf16.msra.mxu0 %v3805_v32  ;;  %v3872_v32 = vld [vmem:[#allocation5 + $0x2e0] ss:$8 sps:$4 sm:$0xff]  }
  0xe1   :  { %1696 = vmatprep.subr.bf16.mxu0 %v3811_v33  ;;  %v3880_v33 = vld [vmem:[#allocation2 + $0x14] ss:$36 sps:$4 sm:$0xff]  }
  0xe3   :  { %1616 = vmatmul.mubr.bf16.vlgmr.msra.gmra.mrb[0].mxu0 %v3806_v34  ;;  %v3877_v34 = vld [vmem:[#allocation5 + $0x2f4] ss:$8 sps:$4 sm:$0xff]  }
  0xe4   :  { %1697 = vmatpush1.bf16.msra.mxu0 %v3809_v35  ;;  %1625 = vmatprep.mubr.bf16.mxu0 %v3815_v36  ;;  %v4009_v35 = vld [vmem:[#allocation5 + $0x90] ss:$8 sps:$4 sm:$0xff]   ;;  %v4010_v36 = vld [vmem:[#allocation5 + $0xa4] ss:$8 sps:$4 sm:$0xff]  }
  0xe5   :  { %1698 = vmatprep.subr.bf16.mxu0 %v3814_v37  ;;  %v3875_v37 = vld [vmem:[#allocation5 + $0x2f0] ss:$8 sps:$4 sm:$0xff]   ;;  %1489 = vmatpush1.bf16.msra.mxu1 %v4009_v35 }
  0xe6   :  { %1490 = vmatprep.subr.bf16.mxu1 %v4010_v36  ;;  %v3938_v35 = vld [vmem:[#allocation5 + $0x3d0] ss:$8 sps:$4 sm:$0xff]   ;;  %v3946_v36 = vld [vmem:[#allocation5 + $0x3e4] ss:$8 sps:$4 sm:$0xff]  }
  0xe8   :  { %1699 = vmatpush1.bf16.msra.mxu0 %v3812_v38  ;;  %v3883_v38 = vld [vmem:[#allocation5 + $0x304] ss:$8 sps:$4 sm:$0xff]  }
  0xe9   :  { %1700 = vmatprep.subr.bf16.mxu0 %v3820_v39  ;;  %v3878_v39 = vld [vmem:[#allocation2 + $0x10] ss:$36 sps:$4 sm:$0xff]  }
  0xeb   :  { %1626 = vmatmul.mubr.bf16.gmra.mrb[4].mxu0 %v3817_v40  ;;  %v4012_v40 = vld [vmem:[#allocation5 + $0xa0] ss:$8 sps:$4 sm:$0xff]  }
  0xec   :  { %1701 = vmatpush1.bf16.msra.mxu0 %v3818_v41  ;;  %1635 = vmatprep.mubr.bf16.mxu0 %v3824_v42  ;;  %v4015_v41 = vld [vmem:[#allocation5 + $0xb4] ss:$8 sps:$4 sm:$0xff]   ;;  %v3881_v42 = vld [vmem:[#allocation5 + $0x300] ss:$8 sps:$4 sm:$0xff]  }
  0xed   :  { %1702 = vmatprep.subr.bf16.mxu0 %v3823_v43  ;;  %v3886_v43 = vld [vmem:[#allocation5 + $0x314] ss:$8 sps:$4 sm:$0xff]   ;;  %1491 = vmatpush1.bf16.msra.mxu1 %v4012_v40  ;;  %v3944_v40 = vld [vmem:[#allocation5 + $0x3e0] ss:$8 sps:$4 sm:$0xff]  }
  0xee   :  { %1492 = vmatprep.subr.bf16.mxu1 %v4015_v41  ;;  %v3955_v41 = vld [vmem:[#allocation2 + $0x1c] ss:$36 sps:$4 sm:$0xff]  }
  0xf0   :  { %1703 = vmatpush1.bf16.msra.mxu0 %v3821_v44  ;;  %v3887_v44 = vld [vmem:[#allocation2 + $0x5c] ss:$36 sps:$4 sm:$0xff]  }
  0xf1   :  { %1704 = vmatprep.subr.bf16.mxu0 %v3829_v45  ;;  %v4021_v45 = vld [vmem:[#allocation5 + $0xb0] ss:$8 sps:$4 sm:$0xff]  }
  0xf2   :  { %1493 = vmatpush1.bf16.msra.mxu1 %v4021_v45  ;;  %v3949_v45 = vld [vmem:[#allocation5 + $0x3f0] ss:$8 sps:$4 sm:$0xff]  }
  0xf3   :  { %1636 = vmatmul.mubr.bf16.gmra.mrb[8].mxu0 %v3826_v46  ;;  %v4022_v46 = vld [vmem:[#allocation5 + $0xc4] ss:$8 sps:$4 sm:$0xff]  }
  0xf4   :  { %1705 = vmatpush1.bf16.msra.mxu0 %v3827_v47  ;;  %1645 = vmatprep.mubr.bf16.mxu0 %v3833_v48  ;;  %v4048_v47 = vld [vmem:[#allocation2 + $0x4] ss:$36 sps:$4 sm:$0xff]   ;;  %v3884_v48 = vld [vmem:[#allocation5 + $0x310] ss:$8 sps:$4 sm:$0xff]  }
  0xf5   :  { %1706 = vmatprep.subr.bf16.mxu0 %v3832_v49  ;;  %v3892_v49 = vld [vmem:[#allocation5 + $0x324] ss:$8 sps:$4 sm:$0xff]   ;;  %1494 = vmatprep.subr.bf16.mxu1 %v4022_v46 }
  0xf6   :  { %1502 = vmatprep.mubr.bf16.mxu1 %v4048_v47  ;;  %v4068_v46 = vld [vmem:[#allocation2 + $0x168] ss:$36 sps:$4 sm:$0xff]   ;;  %v4083_v47 = vld [vmem:[#allocation8 + $0x14] ss:$8 sps:$4 sm:$0xff]  }
  0xf8   :  { %1707 = vmatpush1.bf16.msra.mxu0 %v3830_v50  ;;  %v4024_v50 = vld [vmem:[#allocation5 + $0xc0] ss:$8 sps:$4 sm:$0xff]  }
  0xf9   :  { %1708 = vmatprep.subr.bf16.mxu0 %v3838_v51  ;;  %v3889_v51 = vld [vmem:[#allocation2 + $0x58] ss:$36 sps:$4 sm:$0xff]   ;;  %1495 = vmatpush1.bf16.msra.mxu1 %v4024_v50 }
  0xfa   :  { %1496 = vmatprep.subr.bf16.mxu1 %v4027_v52  ;;  %v4081_v50 = vld [vmem:[#allocation8 + $0x10] ss:$8 sps:$4 sm:$0xff]   ;;  %v4086_v52 = vld [vmem:[#allocation8 + $0x24] ss:$8 sps:$4 sm:$0xff]  }
  0xfb   :  { %1646 = vmatmul.mubr.bf16.gmra.mrb[12].mxu0 %v3835_v53  ;;  %v3890_v53 = vld [vmem:[#allocation5 + $0x320] ss:$8 sps:$4 sm:$0xff]  }
  0xfc   :  { %1709 = vmatpush1.bf16.msra.mxu0 %v3836_v54  ;;  %1655 = vmatprep.mubr.bf16.mxu0 %v3842_v57  ;;  %v3896_v54 = vld [vmem:[#allocation2 + $0xa4] ss:$36 sps:$4 sm:$0xff]  }
  0xfd   :  { %1710 = vmatprep.subr.bf16.mxu0 %v3841_v56  ;;  %v4033_v56 = vld [vmem:[#allocation5 + $0xd0] ss:$8 sps:$4 sm:$0xff]   ;;  %v4034_v57 = vld [vmem:[#allocation5 + $0xe4] ss:$8 sps:$4 sm:$0xff]  }
  0xfe   :  { %1497 = vmatpush1.bf16.msra.mxu1 %v4033_v56  ;;  %v3970_v56 = vld [vmem:[#allocation5 + $0x410] ss:$8 sps:$4 sm:$0xff]  }
  0xff   :  { %1498 = vmatprep.subr.bf16.mxu1 %v4034_v57  ;;  %v4084_v57 = vld [vmem:[#allocation8 + $0x20] ss:$8 sps:$4 sm:$0xff]  }
 0x100   :  { %1711 = vmatpush1.bf16.msra.mxu0 %v3839_v59  ;;  %v3901_v59 = vld [vmem:[#allocation5 + $0x344] ss:$8 sps:$4 sm:$0xff]  }
 0x101   :  { %1712 = vmatprep.subr.bf16.mxu0 %v3847_v61  ;;  %v4039_v61 = vld [vmem:[#allocation5 + $0xf4] ss:$8 sps:$4 sm:$0xff]  }
 0x102   :  { %1499 = vmatpush1.bf16.msra.mxu1 %v4036_v60  ;;  %v4074_v60 = vld [vmem:[#allocation2 + $0x1fc] ss:$36 sps:$4 sm:$0xff]  }
 0x103   :  { %1656 = vmatmul.mubr.bf16.gmra.mrb[16].mxu0 %v3844_v1  ;;  %v3904_v1 = vld [vmem:[#allocation5 + $0x354] ss:$8 sps:$4 sm:$0xff]   ;;  %1500 = vmatprep.subr.bf16.mxu1 %v4039_v61 }
 0x104   :  { %1713 = vmatpush1.bf16.msra.mxu0 %v3845_v2  ;;  %1665 = vmatprep.mubr.bf16.mxu0 %v3851_v4  ;;  %v4045_v2 = vld [vmem:[#allocation5 + $0xf0] ss:$8 sps:$4 sm:$0xff]   ;;  %v3910_v4 = vld [vmem:[#allocation5 + $0x364] ss:$8 sps:$4 sm:$0xff]  }
 0x105   :  { %1714 = vmatprep.subr.bf16.mxu0 %v3850_v3  ;;  %v3902_v3 = vld [vmem:[#allocation5 + $0x350] ss:$8 sps:$4 sm:$0xff]  }
 0x106   :  { %1501 = vmatpush1.bf16.msra.mxu1 %v4045_v2  ;;  %v4089_v61 = vld [vmem:[#allocation8 + $0x34] ss:$8 sps:$4 sm:$0xff]   ;;  %v4092_v2 = vld [vmem:[#allocation8 + $0x44] ss:$8 sps:$4 sm:$0xff]  }
 0x108   :  { %1715 = vmatpush1.bf16.msra.mxu0 %v3848_v7  ;;  %v3907_v7 = vld [vmem:[#allocation2 + $0xe8] ss:$36 sps:$4 sm:$0xff]  }
 0x109   :  { %1716 = vmatprep.subr.bf16.mxu0 %v3856_v8  ;;  %v3908_v8 = vld [vmem:[#allocation5 + $0x360] ss:$8 sps:$4 sm:$0xff]   ;;  %1503 = vmatmul.mubr.bf16.vlgmr.msra.gmra.mrb[0].mxu1 %v4046_v5 }
 0x10a   :  { %1512 = vmatprep.mubr.bf16.mxu1 %v4050_v6  ;;  %v4095_v5 = vld [vmem:[#allocation8 + $0x54] ss:$8 sps:$4 sm:$0xff]  }
 0x10b   :  { %1666 = vmatmul.mubr.bf16.gmra.mrb[20].mxu0 %v3853_v11  ;;  %v3911_v11 = vld [vmem:[#allocation5 + $0x370] ss:$8 sps:$4 sm:$0xff]  }
 0x10c   :  { %1717 = vmatpush1.bf16.msra.mxu0 %v3854_v12  ;;  %1675 = vmatprep.mubr.bf16.mxu0 %v3860_v13  ;;  %v3919_v12 = vld [vmem:[#allocation5 + $0x384] ss:$8 sps:$4 sm:$0xff]   ;;  %v3994_v6 = vld [vmem:[#allocation5 + $0x430] ss:$8 sps:$4 sm:$0xff]  }
 0x10d   :  { %1718 = vmatprep.subr.bf16.mxu0 %v3859_v14  ;;  %v4052_v13 = vld [vmem:[#allocation2 + $0x48] ss:$36 sps:$4 sm:$0xff]   ;;  %v4054_v14 = vld [vmem:[#allocation2 + $0x94] ss:$36 sps:$4 sm:$0xff]  }
 0x110   :  { %1719 = vmatpush1.bf16.msra.mxu0 %v3857_v17  ;;  %v3923_v17 = vld [vmem:[#allocation2 + $0x17c] ss:$36 sps:$4 sm:$0xff]  }
 0x111   :  { %1720 = vmatprep.subr.bf16.mxu0 %v3865_v18  ;;  %v3922_v18 = vld [vmem:[#allocation5 + $0x394] ss:$8 sps:$4 sm:$0xff]   ;;  %1513 = vmatmul.mubr.bf16.gmra.mrb[4].mxu1 %v4052_v13  ;;  %v4006_v13 = vld [vmem:[#allocation5 + $0x440] ss:$8 sps:$4 sm:$0xff]  }
 0x112   :  { %1522 = vmatprep.mubr.bf16.mxu1 %v4054_v14  ;;  %v4020_v14 = vld [vmem:[#allocation5 + $0x454] ss:$8 sps:$4 sm:$0xff]  }
 0x113   :  { %1676 = vmatmul.mubr.bf16.gmra.mrb[24].mxu0 %v3862_v21  ;;  %v4056_v21 = vld [vmem:[#allocation2 + $0x90] ss:$36 sps:$4 sm:$0xff]  }
 0x114   :  { %1721 = vmatpush1.bf16.msra.mxu0 %v3863_v22  ;;  %1685 = vmatprep.mubr.bf16.mxu0 %v3869_v24  ;;  %v4058_v22 = vld [vmem:[#allocation2 + $0xdc] ss:$36 sps:$4 sm:$0xff]  }
 0x115   :  { %1722 = vmatprep.subr.bf16.mxu0 %v3868_v23  ;;  %v3925_v23 = vld [vmem:[#allocation2 + $0x178] ss:$36 sps:$4 sm:$0xff]   ;;  %v3926_v24 = vld [vmem:[#allocation5 + $0x3a0] ss:$8 sps:$4 sm:$0xff]  }
 0x118   :  { %1723 = vmatpush1.bf16.msra.mxu0 %v3866_v27  ;;  %v3929_v27 = vld [vmem:[#allocation5 + $0x3b0] ss:$8 sps:$4 sm:$0xff]  }
 0x119   :  { %1724 = vmatprep.subr.bf16.mxu0 %v3874_v28  ;;  %1523 = vmatmul.mubr.bf16.gmra.mrb[8].mxu1 %v4056_v21  ;;  %v3937_v28 = vld [vmem:[#allocation5 + $0x3c4] ss:$8 sps:$4 sm:$0xff]  }
 0x11a   :  { %1532 = vmatprep.mubr.bf16.mxu1 %v4058_v22  ;;  %v4104_v21 = vld [vmem:[#allocation8 + $0x84] ss:$8 sps:$4 sm:$0xff]   ;;  %v4001_v22 = vld [vmem:[#allocation2 + $0x13c] ss:$36 sps:$4 sm:$0xff]  }
 0x11b   :  { %1686 = vmatmul.mubr.bf16.gmra.mrb[28].mxu0 %v3871_v31  ;;  %v3934_v31 = vld [vmem:[#allocation2 + $0x1c0] ss:$36 sps:$4 sm:$0xff]  }
 0x11c   :  { %1725 = vmatpush1.bf16.msra.mxu0 %v3872_v32  ;;  %1728 = vmatprep.mubr.bf16.mxu0 %v3880_v33  ;;  %v3935_v32 = vld [vmem:[#allocation5 + $0x3c0] ss:$8 sps:$4 sm:$0xff]   ;;  %v3941_v33 = vld [vmem:[#allocation2 + $0x20c] ss:$36 sps:$4 sm:$0xff]  }
 0x11d   :  { %1726 = vmatprep.subr.bf16.mxu0 %v3877_v34  ;;  %v3940_v34 = vld [vmem:[#allocation5 + $0x3d4] ss:$8 sps:$4 sm:$0xff]  }
 0x120   :  { %1727 = vmatpush1.bf16.msra.mxu0 %v3875_v37  ;;  %v4064_v37 = vld [vmem:[#allocation2 + $0x120] ss:$36 sps:$4 sm:$0xff]  }
 0x121   :  { %1809 = vmatprep.subr.bf16.mxu0 %v3883_v38  ;;  %1533 = vmatmul.mubr.bf16.gmra.mrb[12].mxu1 %v4060_v29  ;;  %v4066_v38 = vld [vmem:[#allocation2 + $0x16c] ss:$36 sps:$4 sm:$0xff]   ;;  %v4005_v29 = vld [vmem:[#allocation2 + $0x138] ss:$36 sps:$4 sm:$0xff]  }
 0x122   :  { %1542 = vmatprep.mubr.bf16.mxu1 %v4062_v30  ;;  %v4110_v30 = vld [vmem:[#allocation8 + $0xa4] ss:$8 sps:$4 sm:$0xff]  }
 0x123   :  { %1729 = vmatmul.mubr.bf16.vlgmr.msra.gmra.mrb[0].mxu0 %v3878_v39  ;;  %v3943_v39 = vld [vmem:[#allocation2 + $0x208] ss:$36 sps:$4 sm:$0xff]  }
 0x124   :  { %1810 = vmatpush1.bf16.msra.mxu0 %v3881_v42  ;;  %1738 = vmatprep.mubr.bf16.mxu0 %v3887_v44  ;;  %v3951_v42 = vld [vmem:[#allocation5 + $0x3f4] ss:$8 sps:$4 sm:$0xff]   ;;  %v4080_v44 = vld [vmem:[#allocation8 + $0x4] ss:$8 sps:$4 sm:$0xff]  }
 0x125   :  { %1811 = vmatprep.subr.bf16.mxu0 %v3886_v43  ;;  %v4078_v43 = vld [vmem:[#allocation8] ss:$8 sps:$4 sm:$0xff]   ;;  %2287 = vmatprep.subr.bf16.mxu1 %v4080_v44  ;;  %v4437_v44 = vmov 0  }
 0x126   :  { %2288 = vmatpush1.bf16.msra.mxu1 %v4078_v43  ;;  %v4041_v43 = vld [vmem:[#allocation2 + $0x210] ss:$36 sps:$4 sm:$0xff]  }
 0x127   :  { %2289 = vmatprep.subr.bf16.mxu1 %v4083_v47  ;;  %v4057_v47 = vld [vmem:[#allocation2 + $0xb0] ss:$36 sps:$4 sm:$0xff]  }
 0x128   :  { %1812 = vmatpush1.bf16.msra.mxu0 %v3884_v48  ;;  %v3960_v48 = vld [vmem:[#allocation5 + $0x404] ss:$8 sps:$4 sm:$0xff]  }
 0x129   :  { %1813 = vmatprep.subr.bf16.mxu0 %v3892_v49  ;;  %1543 = vmatmul.mubr.bf16.gmra.mrb[16].mxu1 %v4064_v37  ;;  %v4070_v49 = vld [vmem:[#allocation2 + $0x1b4] ss:$36 sps:$4 sm:$0xff]   ;;  %v4025_v37 = vld [vmem:[#allocation2 + $0x1cc] ss:$36 sps:$4 sm:$0xff]  }
 0x12a   :  { %1552 = vmatprep.mubr.bf16.mxu1 %v4066_v38  ;;  %2290 = vmatpush1.bf16.msra.mxu1 %v4081_v50  ;;  %v4114_v38 = vld [vmem:[#allocation8 + $0xc0] ss:$8 sps:$4 sm:$0xff]  }
 0x12b   :  { %1739 = vmatmul.mubr.bf16.gmra.mrb[4].mxu0 %v3889_v51  ;;  %v3953_v51 = vld [vmem:[#allocation2 + $0x18] ss:$36 sps:$4 sm:$0xff]   ;;  %2291 = vmatprep.subr.bf16.mxu1 %v4086_v52  ;;  %v4069_v50 = vld [vmem:[#allocation2 + $0x188] ss:$36 sps:$4 sm:$0xff]  }
 0x12c   :  { %1814 = vmatpush1.bf16.msra.mxu0 %v3890_v53  ;;  %1748 = vmatprep.mubr.bf16.mxu0 %v3896_v54  ;;  %v3958_v53 = vld [vmem:[#allocation5 + $0x400] ss:$8 sps:$4 sm:$0xff]   ;;  %v4077_v52 = vld [vmem:[#allocation2 + $0x218] ss:$36 sps:$4 sm:$0xff]  }
 0x12d   :  { %1815 = vmatprep.subr.bf16.mxu0 %v3895_v55  ;;  %v3965_v54 = vld [vmem:[#allocation2 + $0x64] ss:$36 sps:$4 sm:$0xff]   ;;  %v3972_v55 = vld [vmem:[#allocation5 + $0x414] ss:$8 sps:$4 sm:$0xff]  }
 0x12e   :  { %2292 = vmatpush1.bf16.msra.mxu1 %v4084_v57 }
 0x12f   :  { %2293 = vmatprep.subr.bf16.mxu1 %v4089_v61 }
 0x130   :  { %1816 = vmatpush1.bf16.msra.mxu0 %v3893_v58  ;;  %v3984_v58 = vld [vmem:[#allocation5 + $0x424] ss:$8 sps:$4 sm:$0xff]  }
 0x131   :  { %1817 = vmatprep.subr.bf16.mxu0 %v3901_v59  ;;  %1553 = vmatmul.mubr.bf16.gmra.mrb[20].mxu1 %v4068_v46  ;;  %v4072_v59 = vld [vmem:[#allocation2 + $0x1b0] ss:$36 sps:$4 sm:$0xff]   ;;  %v4053_v46 = vld [vmem:[#allocation2 + $0x68] ss:$36 sps:$4 sm:$0xff]  }
 0x132   :  { %1562 = vmatprep.mubr.bf16.mxu1 %v4070_v49  ;;  %v4065_v49 = vld [vmem:[#allocation2 + $0x140] ss:$36 sps:$4 sm:$0xff]  }
 0x133   :  { %1749 = vmatmul.mubr.bf16.gmra.mrb[8].mxu0 %v3898_v62  ;;  %v4087_v62 = vld [vmem:[#allocation8 + $0x30] ss:$8 sps:$4 sm:$0xff]  }
 0x134   :  { %1818 = vmatpush1.bf16.msra.mxu0 %v3899_v63  ;;  %1758 = vmatprep.mubr.bf16.mxu0 %v3905_v0  ;;  %v3969_v63 = vld [vmem:[#allocation2 + $0x60] ss:$36 sps:$4 sm:$0xff]   ;;  %v3977_v0 = vld [vmem:[#allocation2 + $0xac] ss:$36 sps:$4 sm:$0xff]  }
 0x135   :  { %1819 = vmatprep.subr.bf16.mxu0 %v3904_v1  ;;  %v3982_v1 = vld [vmem:[#allocation5 + $0x420] ss:$8 sps:$4 sm:$0xff]   ;;  %2294 = vmatpush1.bf16.msra.mxu1 %v4087_v62 }
 0x136   :  { %2295 = vmatprep.subr.bf16.mxu1 %v4092_v2 }
 0x138   :  { %1820 = vmatpush1.bf16.msra.mxu0 %v3902_v3  ;;  %v3996_v3 = vld [vmem:[#allocation5 + $0x434] ss:$8 sps:$4 sm:$0xff]  }
 0x139   :  { %1821 = vmatprep.subr.bf16.mxu0 %v3910_v4  ;;  %1563 = vmatmul.mubr.bf16.gmra.mrb[24].mxu1 %v4072_v59  ;;  %v4090_v4 = vld [vmem:[#allocation8 + $0x40] ss:$8 sps:$4 sm:$0xff]  }
 0x13a   :  { %1572 = vmatprep.mubr.bf16.mxu1 %v4074_v60  ;;  %2296 = vmatpush1.bf16.msra.mxu1 %v4090_v4 }
 0x13b   :  { %1759 = vmatmul.mubr.bf16.gmra.mrb[12].mxu0 %v3907_v7  ;;  %v4076_v7 = vld [vmem:[#allocation2 + $0x1f8] ss:$36 sps:$4 sm:$0xff]   ;;  %2297 = vmatprep.subr.bf16.mxu1 %v4095_v5 }
 0x13c   :  { %1822 = vmatpush1.bf16.msra.mxu0 %v3908_v8  ;;  %1768 = vmatprep.mubr.bf16.mxu0 %v3914_v9  ;;  %v4008_v8 = vld [vmem:[#allocation5 + $0x444] ss:$8 sps:$4 sm:$0xff]   ;;  %v4093_v9 = vld [vmem:[#allocation8 + $0x50] ss:$8 sps:$4 sm:$0xff]  }
 0x13d   :  { %1823 = vmatprep.subr.bf16.mxu0 %v3913_v10  ;;  %v3981_v10 = vld [vmem:[#allocation2 + $0xa8] ss:$36 sps:$4 sm:$0xff]  }
 0x13e   :  { %2298 = vmatpush1.bf16.msra.mxu1 %v4093_v9 }
 0x140   :  { %1824 = vmatpush1.bf16.msra.mxu0 %v3911_v11  ;;  %v4098_v11 = vld [vmem:[#allocation8 + $0x64] ss:$8 sps:$4 sm:$0xff]  }
 0x141   :  { %1825 = vmatprep.subr.bf16.mxu0 %v3919_v12  ;;  %v3989_v12 = vld [vmem:[#allocation2 + $0xf4] ss:$36 sps:$4 sm:$0xff]   ;;  %1573 = vmatmul.mubr.bf16.gmra.mrb[28].mxu1 %v4076_v7 }
 0x142   :  { %2299 = vmatprep.subr.bf16.mxu1 %v4098_v11 }
 0x143   :  { %1769 = vmatmul.mubr.bf16.gmra.mrb[16].mxu0 %v3916_v15  ;;  %v4096_v15 = vld [vmem:[#allocation8 + $0x60] ss:$8 sps:$4 sm:$0xff]  }
 0x144   :  { %1826 = vmatpush1.bf16.msra.mxu0 %v3917_v16  ;;  %1778 = vmatprep.mubr.bf16.mxu0 %v3923_v17  ;;  %v4101_v16 = vld [vmem:[#allocation8 + $0x74] ss:$8 sps:$4 sm:$0xff]  }
 0x145   :  { %1827 = vmatprep.subr.bf16.mxu0 %v3922_v18  ;;  %v4018_v17 = vld [vmem:[#allocation5 + $0x450] ss:$8 sps:$4 sm:$0xff]   ;;  %v4032_v18 = vld [vmem:[#allocation5 + $0x464] ss:$8 sps:$4 sm:$0xff]   ;;  %2300 = vmatpush1.bf16.msra.mxu1 %v4096_v15 }
 0x146   :  { %2301 = vmatprep.subr.bf16.mxu1 %v4101_v16 }
 0x148   :  { %1828 = vmatpush1.bf16.msra.mxu0 %v3920_v19  ;;  %v4099_v19 = vld [vmem:[#allocation8 + $0x70] ss:$8 sps:$4 sm:$0xff]  }
 0x149   :  { %1829 = vmatprep.subr.bf16.mxu0 %v3928_v20  ;;  %v3993_v20 = vld [vmem:[#allocation2 + $0xf0] ss:$36 sps:$4 sm:$0xff]   ;;  %2302 = vmatpush1.bf16.msra.mxu1 %v4099_v19 }
 0x14a   :  { %2303 = vmatprep.subr.bf16.mxu1 %v4104_v21 }
 0x14b   :  { %1779 = vmatmul.mubr.bf16.gmra.mrb[20].mxu0 %v3925_v23  ;;  %v4030_v23 = vld [vmem:[#allocation5 + $0x460] ss:$8 sps:$4 sm:$0xff]  }
 0x14c   :  { %1830 = vmatpush1.bf16.msra.mxu0 %v3926_v24  ;;  %1788 = vmatprep.mubr.bf16.mxu0 %v3932_v25  ;;  %v4044_v24 = vld [vmem:[#allocation5 + $0x474] ss:$8 sps:$4 sm:$0xff]   ;;  %v4102_v25 = vld [vmem:[#allocation8 + $0x80] ss:$8 sps:$4 sm:$0xff]  }
 0x14d   :  { %1831 = vmatprep.subr.bf16.mxu0 %v3931_v26  ;;  %v4107_v26 = vld [vmem:[#allocation8 + $0x94] ss:$8 sps:$4 sm:$0xff]   ;;  %2304 = vmatpush1.bf16.msra.mxu1 %v4102_v25  ;;  %v372_v25 = vlaneseq }
 0x14e   :  { %2305 = vmatprep.subr.bf16.mxu1 %v4107_v26 }
 0x14f   :  { %v373_v26 = vshrl.u32 %v372_v25, 7 }
 0x150   :  { %1832 = vmatpush1.bf16.msra.mxu0 %v3929_v27  ;;  %v4042_v27 = vld [vmem:[#allocation5 + $0x470] ss:$8 sps:$4 sm:$0xff]  }
 0x151   :  { %1833 = vmatprep.subr.bf16.mxu0 %v3937_v28  ;;  %v4105_v28 = vld [vmem:[#allocation8 + $0x90] ss:$8 sps:$4 sm:$0xff]  }
 0x152   :  { %2306 = vmatpush1.bf16.msra.mxu1 %v4105_v28  ;;  %v370_v28 = vld [vmem:[#allocation7] sm:$0x3] }
 0x153   :  { %1789 = vmatmul.mubr.bf16.gmra.mrb[24].mxu0 %v3934_v31  ;;  %v4013_v31 = vld [vmem:[#allocation2 + $0x184] ss:$36 sps:$4 sm:$0xff]   ;;  %2307 = vmatprep.subr.bf16.mxu1 %v4110_v30 }
 0x154   :  { %1834 = vmatpush1.bf16.msra.mxu0 %v3935_v32  ;;  %1798 = vmatprep.mubr.bf16.mxu0 %v3941_v33  ;;  %v4108_v32 = vld [vmem:[#allocation8 + $0xa0] ss:$8 sps:$4 sm:$0xff]   ;;  %v4113_v33 = vld [vmem:[#allocation8 + $0xb4] ss:$8 sps:$4 sm:$0xff]  }
 0x155   :  { %1835 = vmatprep.subr.bf16.mxu0 %v3940_v34  ;;  %v4111_v34 = vld [vmem:[#allocation8 + $0xb0] ss:$8 sps:$4 sm:$0xff]  }
 0x156   :  { %2308 = vmatpush1.bf16.msra.mxu1 %v4108_v32 }
 0x157   :  { %2309 = vmatprep.subr.bf16.mxu1 %v4113_v33 }
 0x158   :  { %1836 = vmatpush1.bf16.msra.mxu0 %v3938_v35  ;;  %v4017_v35 = vld [vmem:[#allocation2 + $0x180] ss:$36 sps:$4 sm:$0xff]  }
 0x159   :  { %1837 = vmatprep.subr.bf16.mxu0 %v3946_v36  ;;  %v4116_v36 = vld [vmem:[#allocation8 + $0xc4] ss:$8 sps:$4 sm:$0xff]  }
 0x15a   :  { %2310 = vmatpush1.bf16.msra.mxu1 %v4111_v34 }
 0x15b   :  { %1799 = vmatmul.mubr.bf16.gmra.mrb[28].mxu0 %v3943_v39  ;;  %2311 = vmatprep.subr.bf16.mxu1 %v4116_v36  ;;  %v4029_v39 = vld [vmem:[#allocation2 + $0x1c8] ss:$36 sps:$4 sm:$0xff]  }
 0x15c   :  { %1838 = vmatpush1.bf16.msra.mxu0 %v3944_v40  ;;  %1841 = vmatprep.mubr.bf16.mxu0 %v3955_v41  ;;  %v4117_v40 = vld [vmem:[#allocation8 + $0xd0] ss:$8 sps:$4 sm:$0xff]   ;;  %v4119_v41 = vld [vmem:[#allocation8 + $0xd4] ss:$8 sps:$4 sm:$0xff]  }
 0x15d   :  { %1839 = vmatprep.subr.bf16.mxu0 %v3951_v42  ;;  %v4037_v42 = vld [vmem:[#allocation2 + $0x214] ss:$36 sps:$4 sm:$0xff]  }
 0x15e   :  { %2312 = vmatpush1.bf16.msra.mxu1 %v4114_v38 }
 0x15f   :  { %2313 = vmatprep.subr.bf16.mxu1 %v4119_v41 }
 0x160   :  { %1840 = vmatpush1.bf16.msra.mxu0 %v3949_v45  ;;  %v4049_v45 = vld [vmem:[#allocation2 + $0x20] ss:$36 sps:$4 sm:$0xff]  }
 0x161   :  { %1922 = vmatprep.subr.bf16.mxu0 %v3960_v48  ;;  %v4061_v48 = vld [vmem:[#allocation2 + $0xf8] ss:$36 sps:$4 sm:$0xff]  }
 0x162   :  { %2314 = vmatpush1.bf16.msra.mxu1 %v4117_v40 }
 0x163   :  { %1842 = vmatmul.mubr.bf16.vlgmr.msra.gmra.mrb[0].mxu0 %v3953_v51  ;;  %v4073_v51 = vld [vmem:[#allocation2 + $0x1d0] ss:$36 sps:$4 sm:$0xff]  }
 0x164   :  { %1923 = vmatpush1.bf16.msra.mxu0 %v3958_v53  ;;  %1851 = vmatprep.mubr.bf16.mxu0 %v3965_v54  ;;  %v4122_v53 = vld [vmem:[#allocation8 + $0xe4] ss:$8 sps:$4 sm:$0xff]   ;;  %v4120_v54 = vld [vmem:[#allocation8 + $0xe0] ss:$8 sps:$4 sm:$0xff]  }
 0x165   :  { %1924 = vmatprep.subr.bf16.mxu0 %v3972_v55  ;;  %2315 = vmatprep.subr.bf16.mxu1 %v4122_v53  ;;  %v4125_v55 = vld [vmem:[#allocation8 + $0xf4] ss:$8 sps:$4 sm:$0xff]  }
 0x166   :  { %2316 = vmatpush1.bf16.msra.mxu1 %v4120_v54 }
 0x167   :  { %2317 = vmatprep.subr.bf16.mxu1 %v4125_v55 }
 0x168   :  { %1925 = vmatpush1.bf16.msra.mxu0 %v3970_v56  ;;  %v4123_v56 = vld [vmem:[#allocation8 + $0xf0] ss:$8 sps:$4 sm:$0xff]  }
 0x169   :  { %1926 = vmatprep.subr.bf16.mxu0 %v3984_v58 }
 0x16a   :  { %2318 = vmatpush1.bf16.msra.mxu1 %v4123_v56 }
 0x16b   :  { %1852 = vmatmul.mubr.bf16.gmra.mrb[4].mxu0 %v3969_v63 }
 0x16c   :  { %1861 = vmatprep.mubr.bf16.mxu0 %v3977_v0  ;;  %1927 = vmatpush1.bf16.msra.mxu0 %v3982_v1 }
 0x16d   :  { %1928 = vmatprep.subr.bf16.mxu0 %v3996_v3 }
 0x170   :  { %1929 = vmatpush1.bf16.msra.mxu0 %v3994_v6 }
 0x171   :  { %1930 = vmatprep.subr.bf16.mxu0 %v4008_v8 }
 0x173   :  { %1862 = vmatmul.mubr.bf16.gmra.mrb[8].mxu0 %v3981_v10 }
 0x174   :  { %1871 = vmatprep.mubr.bf16.mxu0 %v3989_v12  ;;  %1931 = vmatpush1.bf16.msra.mxu0 %v4006_v13 }
 0x175   :  { %1932 = vmatprep.subr.bf16.mxu0 %v4020_v14 }
 0x178   :  { %1933 = vmatpush1.bf16.msra.mxu0 %v4018_v17 }
 0x179   :  { %1934 = vmatprep.subr.bf16.mxu0 %v4032_v18 }
 0x17b   :  { %1872 = vmatmul.mubr.bf16.gmra.mrb[12].mxu0 %v3993_v20 }
 0x17c   :  { %1881 = vmatprep.mubr.bf16.mxu0 %v4001_v22  ;;  %1935 = vmatpush1.bf16.msra.mxu0 %v4030_v23 }
 0x17d   :  { %1936 = vmatprep.subr.bf16.mxu0 %v4044_v24 }
 0x180   :  { %1937 = vmatpush1.bf16.msra.mxu0 %v4042_v27  ;;  %v4645_v27 = vsub.s32 0, %v373_v26 }
 0x182   :  { %v4650_v30 = vrot.slane %v370_v28, %v4645_v27 }
 0x183   :  { %1882 = vmatmul.mubr.bf16.gmra.mrb[16].mxu0 %v4005_v29  ;;  %v4647_v29 = vsub.s32 1, %v373_v26 }
 0x184   :  { %1891 = vmatprep.mubr.bf16.mxu0 %v4013_v31 }
 0x185   :  { %v4653_v31 = vrot.slane %v370_v28, %v4647_v29 }
 0x18b   :  { %1892 = vmatmul.mubr.bf16.gmra.mrb[20].mxu0 %v4017_v35 }
 0x18c   :  { %1901 = vmatprep.mubr.bf16.mxu0 %v4025_v37 }
 0x193   :  { %1902 = vmatmul.mubr.bf16.gmra.mrb[24].mxu0 %v4029_v39 }
 0x194   :  { %1911 = vmatprep.mubr.bf16.mxu0 %v4037_v42 }
 0x19b   :  { %1912 = vmatmul.mubr.bf16.gmra.mrb[28].mxu0 %v4041_v43 }
 0x19c   :  { %1954 = vmatprep.mubr.bf16.mxu0 %v4437_v44 }
 0x1a3   :  { %1955 = vmatmul.mubr.bf16.vlgmr.msra.gmra.mrb[0].mxu0 %v4049_v45 }
 0x1a4   :  { %1964 = vmatprep.mubr.bf16.mxu0 %v4437_v44 }
 0x1ab   :  { %1965 = vmatmul.mubr.bf16.gmra.mrb[4].mxu0 %v4053_v46 }
 0x1ac   :  { %1974 = vmatprep.mubr.bf16.mxu0 %v4437_v44 }
 0x1b3   :  { %1975 = vmatmul.mubr.bf16.gmra.mrb[8].mxu0 %v4057_v47 }
 0x1b4   :  { %1984 = vmatprep.mubr.bf16.mxu0 %v4437_v44 }
 0x1bb   :  { %1985 = vmatmul.mubr.bf16.gmra.mrb[12].mxu0 %v4061_v48 }
 0x1bc   :  { %1994 = vmatprep.mubr.bf16.mxu0 %v4437_v44 }
 0x1c3   :  { %1995 = vmatmul.mubr.bf16.gmra.mrb[16].mxu0 %v4065_v49 }
 0x1c4   :  { %2004 = vmatprep.mubr.bf16.mxu0 %v4437_v44 }
 0x1cb   :  { %2005 = vmatmul.mubr.bf16.gmra.mrb[20].mxu0 %v4069_v50 }
 0x1cc   :  { %2014 = vmatprep.mubr.bf16.mxu0 %v4437_v44 }
 0x1d3   :  { %2015 = vmatmul.mubr.bf16.gmra.mrb[24].mxu0 %v4073_v51 }
 0x1d4   :  { %2024 = vmatprep.mubr.bf16.mxu0 %v4437_v44 }
 0x1db   :  { %2025 = vmatmul.mubr.bf16.gmra.mrb[28].mxu0 %v4077_v52 }
 0x1dc   :  { %v1504_v57 = vpop.f32.mrb[0].mxu1 }
 0x1dd   :  { %v1506_v58 = vpop.f32.mrb[1].mxu1  ;;  %v1505_v32 = vadd.f32 %v1504_v57, %v4650_v30 }
 0x1de   :  { %v1508_v59 = vpop.f32.mrb[2].mxu1  ;;  %v1507_v33 = vadd.f32 %v1506_v58, %v4653_v31 }
 0x1df   :  { %v1510_v60 = vpop.f32.mrb[3].mxu1  ;;  %v1509_v35 = vadd.f32 %v1508_v59, %v4650_v30 }
 0x1e0   :  { %v1511_v38 = vadd.f32 %v1510_v60, %v4653_v31 }
 0x1e4   :  { %v1514_v61 = vpop.f32.mrb[4].mxu1 }
 0x1e5   :  { %v1516_v62 = vpop.f32.mrb[5].mxu1  ;;  %v1515_v46 = vadd.f32 %v1514_v61, %v4650_v30 }
 0x1e6   :  { %v1518_v63 = vpop.f32.mrb[6].mxu1  ;;  %v1517_v49 = vadd.f32 %v1516_v62, %v4653_v31 }
 0x1e7   :  { %v1520_v0 = vpop.f32.mrb[7].mxu1  ;;  %v1519_v53 = vadd.f32 %v1518_v63, %v4650_v30 }
 0x1e8   :  { %v1521_v56 = vadd.f32 %v1520_v0, %v4653_v31 }
 0x1ec   :  { %v4597_v1 = vpop.f32.mrb[8].mxu1 }
 0x1ed   :  { %v4599_v2 = vpop.f32.mrb[9].mxu1  ;;  %v1525_v62 = vadd.f32 %v4597_v1, %v4650_v30 }
 0x1ee   :  { %v4601_v3 = vpop.f32.mrb[10].mxu1  ;;  %v1527_v63 = vadd.f32 %v4599_v2, %v4653_v31 }
 0x1ef   :  { %v4603_v4 = vpop.f32.mrb[11].mxu1 }
 0x1f4   :  { %v4605_v5 = vpop.f32.mrb[12].mxu1 }
 0x1f5   :  { %v4607_v6 = vpop.f32.mrb[13].mxu1 }
 0x1f6   :  { %v4609_v7 = vpop.f32.mrb[14].mxu1 }
 0x1f7   :  { %v4611_v8 = vpop.f32.mrb[15].mxu1 }
 0x1fc   :  { %v4613_v9 = vpop.f32.mrb[16].mxu1 }
 0x1fd   :  { %v4615_v10 = vpop.f32.mrb[17].mxu1 }
 0x1fe   :  { %v4617_v11 = vpop.f32.mrb[18].mxu1 }
 0x1ff   :  { %v4619_v12 = vpop.f32.mrb[19].mxu1 }
 0x204   :  { %v4621_v13 = vpop.f32.mrb[20].mxu1 }
 0x205   :  { %v4623_v14 = vpop.f32.mrb[21].mxu1 }
 0x206   :  { %v4625_v15 = vpop.f32.mrb[22].mxu1 }
 0x207   :  { %v4627_v16 = vpop.f32.mrb[23].mxu1 }
 0x20c   :  { %v4629_v17 = vpop.f32.mrb[24].mxu1 }
 0x20d   :  { %v4631_v18 = vpop.f32.mrb[25].mxu1 }
 0x20e   :  { %v4633_v19 = vpop.f32.mrb[26].mxu1 }
 0x20f   :  { %v4635_v20 = vpop.f32.mrb[27].mxu1 }
 0x214   :  { %v4637_v21 = vpop.f32.mrb[28].mxu1 }
 0x215   :  { %v4639_v22 = vpop.f32.mrb[29].mxu1 }
 0x216   :  { %v4641_v23 = vpop.f32.mrb[30].mxu1 }
 0x217   :  { %v4643_v24 = vpop.f32.mrb[31].mxu1 }
 0x276   :  { %v1956_v34 = vpop.f32.mrb[0].mxu0 }
 0x277   :  { %v3582_v36 = vadd.f32 %v1956_v34, %v1505_v32  ;;  %v1958_v37 = vpop.f32.mrb[1].mxu0 }
 0x278   :  { %v3584_v39 = vadd.f32 %v1958_v37, %v1507_v33  ;;  %v1960_v40 = vpop.f32.mrb[2].mxu0 }
 0x279   :  { %v3586_v41 = vadd.f32 %v1960_v40, %v1509_v35  ;;  %v1962_v42 = vpop.f32.mrb[3].mxu0  ;;  %v2035_v44 = vmax.f32 %v3582_v36, 0.0  ;;  %v1529_v35 = vadd.f32 %v4601_v3, %v4650_v30  ;;  %v1537_v3 = vadd.f32 %v4607_v6, %v4653_v31 }
 0x27a   :  { %v3588_v43 = vadd.f32 %v1962_v42, %v1511_v38  ;;  %v2036_v47 = vmax.f32 %v3584_v39, 0.0  ;;  %v1531_v38 = vadd.f32 %v4603_v4, %v4653_v31 }
 0x27b   :  { %v2037_v45 = vmax.f32 %v3586_v41, 0.0 }
 0x27c   :  { %v2038_v48 = vmax.f32 %v3588_v43, 0.0 }
 0x27d   :  { %v2067_v50 = vpack.c.bf16 %v2037_v45, %v2035_v44  ;;  %v1535_v44 = vadd.f32 %v4605_v5, %v4650_v30 }
 0x27e   :  { %v2068_v51 = vpack.c.bf16 %v2038_v48, %v2036_v47  ;;  %v1966_v52 = vpop.f32.mrb[4].mxu0 }
 0x27f   :  { %v3590_v54 = vadd.f32 %v1966_v52, %v1515_v46  ;;  %v1968_v55 = vpop.f32.mrb[5].mxu0  ;;  %v1541_v52 = vadd.f32 %v4611_v8, %v4653_v31 }
 0x280   :  { %v3592_v57 = vadd.f32 %v1968_v55, %v1517_v49  ;;  %v1970_v58 = vpop.f32.mrb[6].mxu0  ;;  %2319 = vmatprep.mubr.bf16.mxu1 %v2068_v51  ;;  %v1539_v49 = vadd.f32 %v4609_v7, %v4650_v30  ;;  %v1547_v7 = vadd.f32 %v4615_v10, %v4653_v31 }
 0x281   :  { %v3594_v59 = vadd.f32 %v1970_v58, %v1519_v53  ;;  %v1972_v60 = vpop.f32.mrb[7].mxu0  ;;  %2320 = vmatmul.mubr.bf16.vlgmr.msra.gmra.mrb[32].mxu1 %v2067_v50  ;;  %v2039_v25 = vmax.f32 %v3590_v54, 0.0  ;;  %v1545_v58 = vadd.f32 %v4613_v9, %v4650_v30 }
 0x282   :  { %v3596_v61 = vadd.f32 %v1972_v60, %v1521_v56  ;;  %v2040_v28 = vmax.f32 %v3592_v57, 0.0 }
 0x283   :  { %v2041_v26 = vmax.f32 %v3594_v59, 0.0 }
 0x284   :  { %v2042_v32 = vmax.f32 %v3596_v61, 0.0 }
 0x285   :  { %v2069_v33 = vpack.c.bf16 %v2041_v26, %v2039_v25  ;;  %v1549_v26 = vadd.f32 %v4617_v11, %v4650_v30  ;;  %v1557_v11 = vadd.f32 %v4623_v14, %v4653_v31 }
 0x286   :  { %v2070_v34 = vpack.c.bf16 %v2042_v32, %v2040_v28  ;;  %v1976_v0 = vpop.f32.mrb[8].mxu0  ;;  %v1551_v32 = vadd.f32 %v4619_v12, %v4653_v31 }
 0x287   :  { %v3598_v36 = vadd.f32 %v1976_v0, %v1525_v62  ;;  %v1978_v37 = vpop.f32.mrb[9].mxu0 }
 0x288   :  { %v3600_v39 = vadd.f32 %v1978_v37, %v1527_v63  ;;  %v1980_v40 = vpop.f32.mrb[10].mxu0  ;;  %2329 = vmatprep.mubr.bf16.mxu1 %v2070_v34 }
 0x289   :  { %v3602_v1 = vadd.f32 %v1980_v40, %v1529_v35  ;;  %v1982_v41 = vpop.f32.mrb[11].mxu0  ;;  %2330 = vmatmul.mubr.bf16.gmra.mrb[36].mxu1 %v2069_v33  ;;  %v2043_v43 = vmax.f32 %v3598_v36, 0.0  ;;  %v1555_v36 = vadd.f32 %v4621_v13, %v4650_v30 }
 0x28a   :  { %v3604_v42 = vadd.f32 %v1982_v41, %v1531_v38  ;;  %v2044_v45 = vmax.f32 %v3600_v39, 0.0 }
 0x28b   :  { %v2045_v2 = vmax.f32 %v3602_v1, 0.0  ;;  %v1559_v1 = vadd.f32 %v4625_v15, %v4650_v30  ;;  %v1567_v15 = vadd.f32 %v4631_v18, %v4653_v31 }
 0x28c   :  { %v2046_v46 = vmax.f32 %v3604_v42, 0.0 }
 0x28d   :  { %v2071_v47 = vpack.c.bf16 %v2045_v2, %v2043_v43  ;;  %v1561_v43 = vadd.f32 %v4627_v16, %v4653_v31 }
 0x28e   :  { %v2072_v48 = vpack.c.bf16 %v2046_v46, %v2044_v45  ;;  %v1986_v4 = vpop.f32.mrb[12].mxu0 }
 0x28f   :  { %v3606_v50 = vadd.f32 %v1986_v4, %v1535_v44  ;;  %v1988_v51 = vpop.f32.mrb[13].mxu0 }
 0x290   :  { %v3608_v53 = vadd.f32 %v1988_v51, %v1537_v3  ;;  %v1990_v54 = vpop.f32.mrb[14].mxu0  ;;  %2339 = vmatprep.mubr.bf16.mxu1 %v2072_v48  ;;  %v1569_v51 = vadd.f32 %v4633_v19, %v4650_v30  ;;  %v1577_v19 = vadd.f32 %v4639_v22, %v4653_v31 }
 0x291   :  { %v3610_v5 = vadd.f32 %v1990_v54, %v1539_v49  ;;  %v1992_v55 = vpop.f32.mrb[15].mxu0  ;;  %2340 = vmatmul.mubr.bf16.gmra.mrb[40].mxu1 %v2071_v47  ;;  %v2047_v57 = vmax.f32 %v3606_v50, 0.0  ;;  %v1565_v47 = vadd.f32 %v4629_v17, %v4650_v30  ;;  %v1571_v54 = vadd.f32 %v4635_v20, %v4653_v31 }
 0x292   :  { %v3612_v56 = vadd.f32 %v1992_v55, %v1541_v52  ;;  %v2048_v59 = vmax.f32 %v3608_v53, 0.0  ;;  %v1579_v20 = vadd.f32 %v4641_v23, %v4650_v30 }
 0x293   :  { %v2049_v6 = vmax.f32 %v3610_v5, 0.0 }
 0x294   :  { %v2050_v60 = vmax.f32 %v3612_v56, 0.0 }
 0x295   :  { %v2073_v61 = vpack.c.bf16 %v2049_v6, %v2047_v57 }
 0x296   :  { %v2074_v25 = vpack.c.bf16 %v2050_v60, %v2048_v59  ;;  %v1996_v8 = vpop.f32.mrb[16].mxu0 }
 0x297   :  { %v3614_v62 = vadd.f32 %v1996_v8, %v1545_v58  ;;  %v1998_v28 = vpop.f32.mrb[17].mxu0  ;;  %v1575_v58 = vadd.f32 %v4637_v21, %v4650_v30  ;;  %v1581_v8 = vadd.f32 %v4643_v24, %v4653_v31  ;;  %v4126_v30 = vld [vmem:[#allocation14 + $0x40] sm:$0xff]   ;;  %v4128_v24 = vld [vmem:[#allocation14 + $0x48] sm:$0xff]  }
 0x298   :  { %v3616_v63 = vadd.f32 %v1998_v28, %v1547_v7  ;;  %v2000_v33 = vpop.f32.mrb[18].mxu0  ;;  %2349 = vmatprep.mubr.bf16.mxu1 %v2074_v25  ;;  %3493 = vmatprep.subr.bf16.mxu1 %v4126_v30  ;;  %v4129_v31 = vld [vmem:[#allocation14 + $0x8] sm:$0xff]  }
 0x299   :  { %v3618_v9 = vadd.f32 %v2000_v33, %v1549_v26  ;;  %v2002_v34 = vpop.f32.mrb[19].mxu0  ;;  %2350 = vmatmul.mubr.bf16.gmra.mrb[44].mxu1 %v2073_v61  ;;  %v2051_v35 = vmax.f32 %v3614_v62, 0.0 }
 0x29a   :  { %v3620_v0 = vadd.f32 %v2002_v34, %v1551_v32  ;;  %v2052_v37 = vmax.f32 %v3616_v63, 0.0 }
 0x29b   :  { %v2053_v10 = vmax.f32 %v3618_v9, 0.0 }
 0x29c   :  { %v2054_v38 = vmax.f32 %v3620_v0, 0.0 }
 0x29d   :  { %v2075_v39 = vpack.c.bf16 %v2053_v10, %v2051_v35  ;;  %v4127_v10 = vld [vmem:[#allocation14] sm:$0xff]  }
 0x29e   :  { %v2076_v40 = vpack.c.bf16 %v2054_v38, %v2052_v37  ;;  %v2006_v12 = vpop.f32.mrb[20].mxu0  ;;  %3494 = vmatpush3.bf16.msra.mxu1 %v4127_v10  ;;  %v4131_v37 = vld [vmem:[#allocation14 + $0x10] sm:$0xff]   ;;  %v4132_v38 = vld [vmem:[#allocation14 + $0x58] sm:$0xff]  }
 0x29f   :  { %v3622_v41 = vadd.f32 %v2006_v12, %v1555_v36  ;;  %v2008_v42 = vpop.f32.mrb[21].mxu0  ;;  %3495 = vmatprep.subr.bf16.mxu1 %v4128_v24  ;;  %v4130_v36 = vld [vmem:[#allocation14 + $0x50] sm:$0xff]   ;;  %v4136_v12 = vld [vmem:[#allocation14 + $0x68] sm:$0xff]  }
 0x2a0   :  { %v3624_v2 = vadd.f32 %v2008_v42, %v1557_v11  ;;  %v2010_v44 = vpop.f32.mrb[22].mxu0  ;;  %2359 = vmatprep.mubr.bf16.mxu1 %v2076_v40  ;;  %v4133_v11 = vld [vmem:[#allocation14 + $0x18] sm:$0xff]   ;;  %v4135_v40 = vld [vmem:[#allocation14 + $0x20] sm:$0xff]   ;;  %v4139_v42 = vld [vmem:[#allocation14 + $0x30] sm:$0xff]  }
 0x2a1   :  { %v3626_v13 = vadd.f32 %v2010_v44, %v1559_v1  ;;  %v2012_v45 = vpop.f32.mrb[23].mxu0  ;;  %2360 = vmatmul.mubr.bf16.gmra.mrb[48].mxu1 %v2075_v39  ;;  %v2055_v3 = vmax.f32 %v3622_v41, 0.0  ;;  %v4134_v39 = vld [vmem:[#allocation14 + $0x60] sm:$0xff]   ;;  %v4137_v1 = vld [vmem:[#allocation14 + $0x28] sm:$0xff]   ;;  %v4138_v41 = vld [vmem:[#allocation14 + $0x70] sm:$0xff]  }
 0x2a2   :  { %v3628_v46 = vadd.f32 %v2012_v45, %v1561_v43  ;;  %v2056_v48 = vmax.f32 %v3624_v2, 0.0  ;;  %3496 = vmatpush3.bf16.msra.mxu1 %v4129_v31  ;;  %v4140_v43 = vld [vmem:[#allocation14 + $0x78] sm:$0xff]   ;;  %v4142_v44 = vld [vmem:[#allocation14 + $0xc0] sm:$0xff]  }
 0x2a3   :  { %v2057_v14 = vmax.f32 %v3626_v13, 0.0  ;;  %3497 = vmatprep.subr.bf16.mxu1 %v4130_v36  ;;  %v4141_v2 = vld [vmem:[#allocation14 + $0x38] sm:$0xff]  }
 0x2a4   :  { %v2058_v4 = vmax.f32 %v3628_v46, 0.0 }
 0x2a5   :  { %v2077_v49 = vpack.c.bf16 %v2057_v14, %v2055_v3  ;;  %v2115_v14 = vld [vmem:[#allocation10] sm:$0x3] }
 0x2a6   :  { %v2078_v50 = vpack.c.bf16 %v2058_v4, %v2056_v48  ;;  %v2016_v16 = vpop.f32.mrb[24].mxu0  ;;  %3498 = vmatpush3.bf16.msra.mxu1 %v4131_v37 }
 0x2a7   :  { %v3630_v52 = vadd.f32 %v2016_v16, %v1565_v47  ;;  %v2018_v53 = vpop.f32.mrb[25].mxu0  ;;  %3499 = vmatprep.subr.bf16.mxu1 %v4132_v38  ;;  %v4712_v47 = vrot.slane %v2115_v14, %v4645_v27 }
 0x2a8   :  { %v3632_v5 = vadd.f32 %v2018_v53, %v1567_v15  ;;  %v2020_v55 = vpop.f32.mrb[26].mxu0  ;;  %2369 = vmatprep.mubr.bf16.mxu1 %v2078_v50 }
 0x2a9   :  { %v3634_v17 = vadd.f32 %v2020_v55, %v1569_v51  ;;  %v2022_v56 = vpop.f32.mrb[27].mxu0  ;;  %2370 = vmatmul.mubr.bf16.gmra.mrb[52].mxu1 %v2077_v49  ;;  %v2059_v6 = vmax.f32 %v3630_v52, 0.0  ;;  %v4718_v49 = vrot.slane %v2115_v14, %v4647_v29 }
 0x2aa   :  { %v3636_v57 = vadd.f32 %v2022_v56, %v1571_v54  ;;  %v2060_v59 = vmax.f32 %v3632_v5, 0.0  ;;  %3500 = vmatpush3.bf16.msra.mxu1 %v4133_v11 }
 0x2ab   :  { %v2061_v18 = vmax.f32 %v3634_v17, 0.0  ;;  %3501 = vmatprep.subr.bf16.mxu1 %v4134_v39 }
 0x2ac   :  { %v2062_v60 = vmax.f32 %v3636_v57, 0.0 }
 0x2ad   :  { %v2079_v7 = vpack.c.bf16 %v2061_v18, %v2059_v6 }
 0x2ae   :  { %v2080_v61 = vpack.c.bf16 %v2062_v60, %v2060_v59  ;;  %v2026_v25 = vpop.f32.mrb[28].mxu0  ;;  %3502 = vmatpush3.bf16.msra.mxu1 %v4135_v40 }
 0x2af   :  { %v3638_v26 = vadd.f32 %v2026_v25, %v1575_v58  ;;  %v2028_v62 = vpop.f32.mrb[29].mxu0  ;;  %3503 = vmatprep.subr.bf16.mxu1 %v4136_v12  ;;  %v2424_v12 = vld [vmem:[#allocation11] sm:$0x3] }
 0x2b0   :  { %v3640_v28 = vadd.f32 %v2028_v62, %v1577_v19  ;;  %v2030_v32 = vpop.f32.mrb[30].mxu0  ;;  %2379 = vmatprep.mubr.bf16.mxu1 %v2080_v61 }
 0x2b1   :  { %v3642_v21 = vadd.f32 %v2030_v32, %v1579_v20  ;;  %v2032_v63 = vpop.f32.mrb[31].mxu0  ;;  %2380 = vmatmul.mubr.bf16.gmra.mrb[56].mxu1 %v2079_v7  ;;  %v2063_v9 = vmax.f32 %v3638_v26, 0.0 }
 0x2b2   :  { %v3644_v33 = vadd.f32 %v2032_v63, %v1581_v8  ;;  %v2064_v34 = vmax.f32 %v3640_v28, 0.0  ;;  %3504 = vmatpush3.bf16.msra.mxu1 %v4137_v1 }
 0x2b3   :  { %v2065_v22 = vmax.f32 %v3642_v21, 0.0  ;;  %3505 = vmatprep.subr.bf16.mxu1 %v4138_v41 }
 0x2b4   :  { %v2066_v0 = vmax.f32 %v3644_v33, 0.0 }
 0x2b5   :  { %v2081_v35 = vpack.c.bf16 %v2065_v22, %v2063_v9 }
 0x2b6   :  { %v2082_v23 = vpack.c.bf16 %v2066_v0, %v2064_v34  ;;  %3506 = vmatpush3.bf16.msra.mxu1 %v4139_v42 }
 0x2b7   :  { %3507 = vmatprep.subr.bf16.mxu1 %v4140_v43 }
 0x2b8   :  { %2389 = vmatprep.mubr.bf16.mxu1 %v2082_v23 }
 0x2b9   :  { %2390 = vmatmul.mubr.bf16.gmra.mrb[60].mxu1 %v2081_v35 }
 0x2ba   :  { %3508 = vmatpush3.bf16.msra.mxu1 %v4141_v2  ;;  %v2444_v2 = vld [vmem:[#allocation13] sm:$0x3] }
 0x2bb   :  { %3515 = vmatprep.subr.bf16.mxu1 %v4142_v44 }
 0x354   :  { %v2321_v13 = vpop.f32.mrb[32].mxu1 }
 0x355   :  { %v2323_v45 = vpop.f32.mrb[33].mxu1  ;;  %v2322_v54 = vadd.f32 %v2321_v13, %v4712_v47 }
 0x356   :  { %v2325_v46 = vpop.f32.mrb[34].mxu1  ;;  %v2324_v17 = vadd.f32 %v2323_v45, %v4718_v49 }
 0x357   :  { %v2327_v3 = vpop.f32.mrb[35].mxu1  ;;  %v2326_v6 = vadd.f32 %v2325_v46, %v4712_v47 }
 0x358   :  { %v2328_v60 = vadd.f32 %v2327_v3, %v4718_v49  ;;  %v4766_v3 = vrot.slane %v2424_v12, %v4645_v27 }
 0x35c   :  { %v2331_v48 = vpop.f32.mrb[36].mxu1 }
 0x35d   :  { %v4715_v4 = vadd.f32 %v2331_v48, %v4712_v47  ;;  %v2333_v15 = vpop.f32.mrb[37].mxu1 }
 0x35e   :  { %v2335_v50 = vpop.f32.mrb[38].mxu1  ;;  %v4738_v62 = vadd.f32 %v2333_v15, %v4718_v49 }
 0x35f   :  { %v4721_v16 = vadd.f32 %v2335_v50, %v4712_v47  ;;  %v2337_v51 = vpop.f32.mrb[39].mxu1 }
 0x360   :  { %v4724_v52 = vadd.f32 %v2337_v51, %v4718_v49  ;;  %v4771_v51 = vrot.slane %v2424_v12, %v4647_v29  ;;  %v4143_v12 = vld [vmem:[#allocation14 + $0x80] sm:$0xff]  }
 0x364   :  { %v2341_v53 = vpop.f32.mrb[40].mxu1 }
 0x365   :  { %v2342_v5 = vadd.f32 %v2341_v53, %v4712_v47  ;;  %v2343_v55 = vpop.f32.mrb[41].mxu1 }
 0x366   :  { %v2344_v56 = vadd.f32 %v2343_v55, %v4718_v49  ;;  %v2345_v57 = vpop.f32.mrb[42].mxu1 }
 0x367   :  { %v2400_v18 = vmax.f32 %v2322_v54, %v2342_v5  ;;  %v2346_v58 = vadd.f32 %v2345_v57, %v4712_v47  ;;  %v2347_v59 = vpop.f32.mrb[43].mxu1  ;;  %v4775_v5 = vrot.slane %v2444_v2, %v4645_v27  ;;  %v4778_v57 = vrot.slane %v2444_v2, %v4647_v29  ;;  %v4152_v2 = vld [vmem:[#allocation14 + $0xe8] sm:$0xff]  }
 0x368   :  { %v2401_v19 = vmax.f32 %v2324_v17, %v2344_v56  ;;  %v2348_v7 = vadd.f32 %v2347_v59, %v4718_v49 }
 0x369   :  { %v2402_v20 = vmax.f32 %v2326_v6, %v2346_v58 }
 0x36a   :  { %v2403_v61 = vmax.f32 %v2328_v60, %v2348_v7 }
 0x36c   :  { %v2351_v25 = vpop.f32.mrb[44].mxu1 }
 0x36d   :  { %v4735_v8 = vadd.f32 %v2351_v25, %v4712_v47  ;;  %v2353_v26 = vpop.f32.mrb[45].mxu1 }
 0x36e   :  { %v4741_v28 = vadd.f32 %v2353_v26, %v4718_v49  ;;  %v2355_v32 = vpop.f32.mrb[46].mxu1 }
 0x36f   :  { %v2404_v21 = vmax.f32 %v4715_v4, %v4735_v8  ;;  %v4746_v63 = vadd.f32 %v2355_v32, %v4712_v47  ;;  %v2357_v33 = vpop.f32.mrb[47].mxu1 }
 0x370   :  { %v2405_v9 = vmax.f32 %v4738_v62, %v4741_v28  ;;  %v4751_v22 = vadd.f32 %v2357_v33, %v4718_v49 }
 0x371   :  { %v2406_v34 = vmax.f32 %v4721_v16, %v4746_v63  ;;  %v4146_v16 = vld [vmem:[#allocation14 + $0xd0] sm:$0xff]  }
 0x372   :  { %v2407_v0 = vmax.f32 %v4724_v52, %v4751_v22  ;;  %v4147_v22 = vld [vmem:[#allocation14 + $0x90] sm:$0xff]  }
 0x374   :  { %v2361_v35 = vpop.f32.mrb[48].mxu1 }
 0x375   :  { %v2363_v23 = vpop.f32.mrb[49].mxu1  ;;  %v2362_v1 = vadd.f32 %v2361_v35, %v4712_v47 }
 0x376   :  { %v2365_v30 = vpop.f32.mrb[50].mxu1  ;;  %v2364_v43 = vadd.f32 %v2363_v23, %v4718_v49 }
 0x377   :  { %v2367_v10 = vpop.f32.mrb[51].mxu1  ;;  %v2366_v45 = vadd.f32 %v2365_v30, %v4712_v47 }
 0x378   :  { %v2368_v15 = vadd.f32 %v2367_v10, %v4718_v49 }
 0x37c   :  { %v2371_v24 = vpop.f32.mrb[52].mxu1 }
 0x37d   :  { %v2372_v31 = vadd.f32 %v2371_v24, %v4712_v47  ;;  %v2373_v36 = vpop.f32.mrb[53].mxu1 }
 0x37e   :  { %v2375_v37 = vpop.f32.mrb[54].mxu1  ;;  %v2374_v27 = vadd.f32 %v2373_v36, %v4718_v49 }
 0x37f   :  { %v2376_v38 = vadd.f32 %v2375_v37, %v4712_v47  ;;  %v2377_v11 = vpop.f32.mrb[55].mxu1 }
 0x380   :  { %v2378_v39 = vadd.f32 %v2377_v11, %v4718_v49 }
 0x384   :  { %v2381_v40 = vpop.f32.mrb[56].mxu1 }
 0x385   :  { %v2382_v41 = vadd.f32 %v2381_v40, %v4712_v47  ;;  %v2383_v42 = vpop.f32.mrb[57].mxu1 }
 0x386   :  { %v2384_v44 = vadd.f32 %v2383_v42, %v4718_v49  ;;  %v2385_v13 = vpop.f32.mrb[58].mxu1 }
 0x387   :  { %v2408_v46 = vmax.f32 %v2362_v1, %v2382_v41  ;;  %v2386_v14 = vadd.f32 %v2385_v13, %v4712_v47  ;;  %v2387_v48 = vpop.f32.mrb[59].mxu1  ;;  %v4144_v41 = vld [vmem:[#allocation14 + $0xc8] sm:$0xff]  }
 0x388   :  { %v2409_v50 = vmax.f32 %v2364_v43, %v2384_v44  ;;  %v2388_v53 = vadd.f32 %v2387_v48, %v4718_v49  ;;  %v4151_v43 = vld [vmem:[#allocation14 + $0xa0] sm:$0xff]   ;;  %v4153_v44 = vld [vmem:[#allocation14 + $0xa8] sm:$0xff]   ;;  %v4156_v48 = vld [vmem:[#allocation14 + $0xf8] sm:$0xff]  }
 0x389   :  { %v2416_v54 = vmax.f32 %v2400_v18, %v2408_v46  ;;  %v2410_v55 = vmax.f32 %v2366_v45, %v2386_v14  ;;  %v4154_v45 = vld [vmem:[#allocation14 + $0xf0] sm:$0xff]  }
 0x38a   :  { %v2417_v17 = vmax.f32 %v2401_v19, %v2409_v50  ;;  %v2411_v56 = vmax.f32 %v2368_v15, %v2388_v53  ;;  %v4155_v14 = vld [vmem:[#allocation14 + $0xb0] sm:$0xff]   ;;  %v4157_v53 = vld [vmem:[#allocation14 + $0xb8] sm:$0xff]  }
 0x38b   :  { %v2436_v6 = vmul.f32 %v4766_v3, %v2416_v54  ;;  %v2418_v58 = vmax.f32 %v2402_v20, %v2410_v55  ;;  %v4158_v55 = vld [vmem:[#allocation14 + $0x140] sm:$0xff]  }
 0x38c   :  { %v2437_v59 = vmul.f32 %v4771_v51, %v2417_v17  ;;  %v2419_v60 = vmax.f32 %v2403_v61, %v2411_v56  ;;  %v2391_v7 = vpop.f32.mrb[60].mxu1 }
 0x38d   :  { %v2456_v25 = vadd.f32 %v4775_v5, %v2436_v6  ;;  %v2392_v18 = vadd.f32 %v2391_v7, %v4712_v47  ;;  %v2393_v26 = vpop.f32.mrb[61].mxu1  ;;  %v2438_v13 = vmul.f32 %v4766_v3, %v2418_v58  ;;  %v4160_v6 = vld [vmem:[#allocation14 + $0x148] sm:$0xff]   ;;  %v4166_v7 = vld [vmem:[#allocation14 + $0x160] sm:$0xff]  }
 0x38e   :  { %v2439_v19 = vmul.f32 %v4771_v51, %v2419_v60  ;;  %v2394_v62 = vadd.f32 %v2393_v26, %v4718_v49  ;;  %v2395_v29 = vpop.f32.mrb[62].mxu1  ;;  %v2457_v28 = vadd.f32 %v4778_v57, %v2437_v59  ;;  %v4161_v58 = vld [vmem:[#allocation14 + $0x108] sm:$0xff]   ;;  %v4164_v59 = vld [vmem:[#allocation14 + $0x158] sm:$0xff]  }
 0x38f   :  { %v2464_v32 = vmax.f32 %v2456_v25, 0.0  ;;  %v2412_v20 = vmax.f32 %v2372_v31, %v2392_v18  ;;  %v2396_v33 = vadd.f32 %v2395_v29, %v4712_v47  ;;  %v2397_v61 = vpop.f32.mrb[63].mxu1  ;;  %v2458_v15 = vadd.f32 %v4775_v5, %v2438_v13  ;;  %v4165_v60 = vld [vmem:[#allocation14 + $0x118] sm:$0xff]   ;;  %v4167_v25 = vld [vmem:[#allocation14 + $0x120] sm:$0xff]   ;;  %v4168_v18 = vld [vmem:[#allocation14 + $0x168] sm:$0xff]  }
 0x390   :  { %v2413_v35 = vmax.f32 %v2374_v27, %v2394_v62  ;;  %v2398_v23 = vadd.f32 %v2397_v61, %v4718_v49  ;;  %v2465_v30 = vmax.f32 %v2457_v28, 0.0  ;;  %v2459_v10 = vadd.f32 %v4778_v57, %v2439_v19  ;;  %v4169_v26 = vld [vmem:[#allocation14 + $0x128] sm:$0xff]   ;;  %v4170_v27 = vld [vmem:[#allocation14 + $0x170] sm:$0xff]   ;;  %v4172_v62 = vld [vmem:[#allocation14 + $0x178] sm:$0xff]  }
 0x391   :  { %v2420_v24 = vmax.f32 %v2404_v21, %v2412_v20  ;;  %v2414_v36 = vmax.f32 %v2376_v38, %v2396_v33  ;;  %v2472_v31 = vpack.c.bf16 %v2464_v32, %v2464_v32  ;;  %v4145_v38 = vld [vmem:[#allocation14 + $0x88] sm:$0xff]   ;;  %v2466_v54 = vmax.f32 %v2458_v15, 0.0  ;;  %v4171_v19 = vld [vmem:[#allocation14 + $0x130] sm:$0xff]   ;;  %v4173_v29 = vld [vmem:[#allocation14 + $0x138] sm:$0xff]  }
 0x392   :  { %v2421_v37 = vmax.f32 %v2405_v9, %v2413_v35  ;;  %v2415_v11 = vmax.f32 %v2378_v39, %v2398_v23  ;;  %v2473_v40 = vpack.c.bf16 %v2465_v30, %v2465_v30  ;;  %v2467_v1 = vmax.f32 %v2459_v10, 0.0  ;;  %v4150_v39 = vld [vmem:[#allocation14 + $0xe0] sm:$0xff]   ;;  %v4176_v35 = vld [vmem:[#allocation14 + $0x1c8] sm:$0xff]   ;;  %v4178_v10 = vld [vmem:[#allocation14 + $0x1d0] sm:$0xff]  }
 0x393   :  { %v2440_v47 = vmul.f32 %v4766_v3, %v2420_v24  ;;  %v2422_v49 = vmax.f32 %v2406_v34, %v2414_v36  ;;  %v4148_v34 = vld [vmem:[#allocation14 + $0xd8] sm:$0xff]   ;;  %v2474_v56 = vpack.c.bf16 %v2466_v54, %v2466_v54  ;;  %v4174_v32 = vld [vmem:[#allocation14 + $0x1c0] sm:$0xff]   ;;  %v4177_v30 = vld [vmem:[#allocation14 + $0x188] sm:$0xff]  }
 0x394   :  { %v2423_v42 = vmax.f32 %v2407_v0, %v2415_v11  ;;  %3031 = vmatprep.mubr.bf16.mxu1 %v2473_v40  ;;  %v2475_v4 = vpack.c.bf16 %v2467_v1, %v2467_v1  ;;  %v4149_v0 = vld [vmem:[#allocation14 + $0x98] sm:$0xff]   ;;  %v2441_v46 = vmul.f32 %v4771_v51, %v2421_v37  ;;  %v4175_v33 = vld [vmem:[#allocation14 + $0x180] sm:$0xff]   ;;  %v4179_v24 = vld [vmem:[#allocation14 + $0x190] sm:$0xff]  }
 0x395   :  { %v2442_v8 = vmul.f32 %v4766_v3, %v2422_v49  ;;  %3032 = vmatmul.mubr.bf16.vlgmr.msra.gmra.mrb[64].mxu1 %v2472_v31  ;;  %v4803_v21 = vadd.f32 %v4775_v5, %v2440_v47  ;;  %v4159_v3 = vld [vmem:[#allocation14 + $0x100] sm:$0xff]   ;;  %v4180_v36 = vld [vmem:[#allocation14 + $0x1d8] sm:$0xff]   ;;  %v4185_v1 = vld [vmem:[#allocation14 + $0x1a8] sm:$0xff]  }
 0x396   :  { %v2443_v9 = vmul.f32 %v4771_v51, %v2423_v42  ;;  %3516 = vmatpush3.bf16.msra.mxu1 %v4143_v12  ;;  %3071 = vmatprep.mubr.bf16.mxu1 %v2475_v4  ;;  %v2461_v50 = vadd.f32 %v4778_v57, %v2441_v46  ;;  %v4181_v37 = vld [vmem:[#allocation14 + $0x198] sm:$0xff]   ;;  %v4182_v11 = vld [vmem:[#allocation14 + $0x1e0] sm:$0xff]   ;;  %v4184_v12 = vld [vmem:[#allocation14 + $0x1e8] sm:$0xff]  }
 0x397   :  { %3517 = vmatprep.subr.bf16.mxu1 %v4144_v41  ;;  %v4807_v63 = vadd.f32 %v4775_v5, %v2442_v8  ;;  %v4162_v5 = vld [vmem:[#allocation14 + $0x150] sm:$0xff]   ;;  %v2468_v28 = vmax.f32 %v4803_v21, 0.0  ;;  %v4183_v40 = vld [vmem:[#allocation14 + $0x1a0] sm:$0xff]   ;;  %v4188_v49 = vld [vmem:[#allocation14 + $0x1f8] sm:$0xff]  }
 0x398   :  { %v4810_v52 = vadd.f32 %v4778_v57, %v2443_v9  ;;  %v2469_v17 = vmax.f32 %v2461_v50, 0.0  ;;  %v4163_v57 = vld [vmem:[#allocation14 + $0x110] sm:$0xff]   ;;  %v4189_v41 = vld [vmem:[#allocation14 + $0x1b8] sm:$0xff]  }
 0x399   :  { %v2476_v61 = vpack.c.bf16 %v2468_v28, %v2468_v28  ;;  %v4186_v31 = vld [vmem:[#allocation14 + $0x1f0] sm:$0xff]   ;;  %v2470_v42 = vmax.f32 %v4807_v63, 0.0 }
 0x39a   :  { %3518 = vmatpush3.bf16.msra.mxu1 %v4145_v38  ;;  %v2477_v51 = vpack.c.bf16 %v2469_v17, %v2469_v17  ;;  %v2471_v20 = vmax.f32 %v4810_v52, 0.0  ;;  %v4187_v47 = vld [vmem:[#allocation14 + $0x1b0] sm:$0xff]   ;;  %v3428_v52 = vld [vmem:[#allocation16] ss:$0 sm:$0xff] }
 0x39b   :  { %3519 = vmatprep.subr.bf16.mxu1 %v4146_v16  ;;  %v2478_v4 = vpack.c.bf16 %v2470_v42, %v2470_v42 }
 0x39c   :  { %v2479_v23 = vpack.c.bf16 %v2471_v20, %v2471_v20 }
 0x39e   :  { %3520 = vmatpush3.bf16.msra.mxu1 %v4147_v22 }
 0x39f   :  { %3521 = vmatprep.subr.bf16.mxu1 %v4148_v34 }
 0x3a2   :  { %3522 = vmatpush3.bf16.msra.mxu1 %v4149_v0 }
 0x3a3   :  { %3523 = vmatprep.subr.bf16.mxu1 %v4150_v39 }
 0x3a6   :  { %3524 = vmatpush3.bf16.msra.mxu1 %v4151_v43 }
 0x3a7   :  { %3525 = vmatprep.subr.bf16.mxu1 %v4152_v2 }
 0x3aa   :  { %3526 = vmatpush3.bf16.msra.mxu1 %v4153_v44 }
 0x3ab   :  { %3527 = vmatprep.subr.bf16.mxu1 %v4154_v45 }
 0x3ae   :  { %3528 = vmatpush3.bf16.msra.mxu1 %v4155_v14 }
 0x3af   :  { %3529 = vmatprep.subr.bf16.mxu1 %v4156_v48 }
 0x3b2   :  { %3530 = vmatpush3.bf16.msra.mxu1 %v4157_v53 }
 0x3b3   :  { %3537 = vmatprep.subr.bf16.mxu1 %v4158_v55 }
 0x3b5   :  { %3072 = vmatmul.mubr.bf16.vlgmr.msra.gmra.mrb[68].mxu1 %v2474_v56 }
 0x3b6   :  { %3538 = vmatpush3.bf16.msra.mxu1 %v4159_v3  ;;  %3111 = vmatprep.mubr.bf16.mxu1 %v2477_v51 }
 0x3b7   :  { %3539 = vmatprep.subr.bf16.mxu1 %v4160_v6 }
 0x3ba   :  { %3540 = vmatpush3.bf16.msra.mxu1 %v4161_v58 }
 0x3bb   :  { %3541 = vmatprep.subr.bf16.mxu1 %v4162_v5 }
 0x3be   :  { %3542 = vmatpush3.bf16.msra.mxu1 %v4163_v57 }
 0x3bf   :  { %3543 = vmatprep.subr.bf16.mxu1 %v4164_v59 }
 0x3c2   :  { %3544 = vmatpush3.bf16.msra.mxu1 %v4165_v60 }
 0x3c3   :  { %3545 = vmatprep.subr.bf16.mxu1 %v4166_v7 }
 0x3c6   :  { %3546 = vmatpush3.bf16.msra.mxu1 %v4167_v25 }
 0x3c7   :  { %3547 = vmatprep.subr.bf16.mxu1 %v4168_v18 }
 0x3ca   :  { %3548 = vmatpush3.bf16.msra.mxu1 %v4169_v26 }
 0x3cb   :  { %3549 = vmatprep.subr.bf16.mxu1 %v4170_v27 }
 0x3ce   :  { %3550 = vmatpush3.bf16.msra.mxu1 %v4171_v19 }
 0x3cf   :  { %3551 = vmatprep.subr.bf16.mxu1 %v4172_v62 }
 0x3d2   :  { %3552 = vmatpush3.bf16.msra.mxu1 %v4173_v29 }
 0x3d3   :  { %3559 = vmatprep.subr.bf16.mxu1 %v4174_v32 }
 0x3d5   :  { %3112 = vmatmul.mubr.bf16.vlgmr.msra.gmra.mrb[72].mxu1 %v2476_v61 }
 0x3d6   :  { %3560 = vmatpush3.bf16.msra.mxu1 %v4175_v33  ;;  %3151 = vmatprep.mubr.bf16.mxu1 %v2479_v23 }
 0x3d7   :  { %3561 = vmatprep.subr.bf16.mxu1 %v4176_v35 }
 0x3da   :  { %3562 = vmatpush3.bf16.msra.mxu1 %v4177_v30 }
 0x3db   :  { %3563 = vmatprep.subr.bf16.mxu1 %v4178_v10 }
 0x3de   :  { %3564 = vmatpush3.bf16.msra.mxu1 %v4179_v24 }
 0x3df   :  { %3565 = vmatprep.subr.bf16.mxu1 %v4180_v36 }
 0x3e2   :  { %3566 = vmatpush3.bf16.msra.mxu1 %v4181_v37 }
 0x3e3   :  { %3567 = vmatprep.subr.bf16.mxu1 %v4182_v11 }
 0x3e6   :  { %3568 = vmatpush3.bf16.msra.mxu1 %v4183_v40 }
 0x3e7   :  { %3569 = vmatprep.subr.bf16.mxu1 %v4184_v12 }
 0x3ea   :  { %3570 = vmatpush3.bf16.msra.mxu1 %v4185_v1 }
 0x3eb   :  { %3571 = vmatprep.subr.bf16.mxu1 %v4186_v31 }
 0x3ee   :  { %3572 = vmatpush3.bf16.msra.mxu1 %v4187_v47 }
 0x3ef   :  { %3573 = vmatprep.subr.bf16.mxu1 %v4188_v49 }
 0x3f2   :  { %3574 = vmatpush3.bf16.msra.mxu1 %v4189_v41 }
 0x3f5   :  { %3152 = vmatmul.mubr.bf16.vlgmr.msra.gmra.mrb[76].mxu1 %v2478_v4 }
 0x468   :  { %v3509_v8 = vpop.f32.mrb[64].mxu1 }
 0x469   :  { %v3510_v21 = vpop.f32.mrb[65].mxu1 }
 0x46a   :  { %v3511_v9 = vadd.f32 %v3510_v21, %v3509_v8  ;;  %v3512_v38 = vpop.f32.mrb[66].mxu1 }
 0x46b   :  { %v3513_v16 = vpop.f32.mrb[67].mxu1 }
 0x46c   :  { %v3034_v0 = vadd.f32 %v3511_v9, %v3428_v52 }
 0x488   :  { %v3531_v22 = vpop.f32.mrb[68].mxu1 }
 0x489   :  { %v3532_v34 = vpop.f32.mrb[69].mxu1 }
 0x48a   :  { %v3533_v39 = vadd.f32 %v3532_v34, %v3531_v22  ;;  %v3534_v43 = vpop.f32.mrb[70].mxu1 }
 0x48b   :  { %v3535_v2 = vpop.f32.mrb[71].mxu1 }
 0x48c   :  { %v3074_v44 = vadd.f32 %v3533_v39, %v3034_v0 }
 0x4a8   :  { %v3553_v13 = vpop.f32.mrb[72].mxu1 }
 0x4a9   :  { %v3554_v45 = vpop.f32.mrb[73].mxu1 }
 0x4aa   :  { %v3555_v46 = vadd.f32 %v3554_v45, %v3553_v13  ;;  %v3556_v63 = vpop.f32.mrb[74].mxu1 }
 0x4ab   :  { %v3557_v14 = vpop.f32.mrb[75].mxu1 }
 0x4ac   :  { %v3114_v48 = vadd.f32 %v3555_v46, %v3074_v44 }
 0x4c8   :  { %v3575_v15 = vpop.f32.mrb[76].mxu1 }
 0x4c9   :  { %v3576_v50 = vpop.f32.mrb[77].mxu1 }
 0x4ca   :  { %v3577_v53 = vadd.f32 %v3576_v50, %v3575_v15  ;;  %v3578_v54 = vpop.f32.mrb[78].mxu1 }
 0x4cb   :  { %v3579_v55 = vpop.f32.mrb[79].mxu1 }
 0x4cc   :  { %v3154_v17 = vadd.f32 %v3577_v53, %v3114_v48 }
 0x4ce   :  { %3160 = vst.msk [vmem:[#allocation17] sm:$0xff] %vm3159_vm0, %v3154_v17 }
 0x4cf   :  { %4399 = shalt.err (!%p4396_p6)
}
 0x4d0   :  { %s4400_s20 = scalar_lea.hbm %s4840_s9, 128 }
 0x4d1   :  { %p4401_p7 = scmp.ne.s32.totalorder %s4840_s9, %s4400_s20  ;;  %p4404_p8 = scmp.lt.u32.totalorder %s4400_s20, %s4840_s9 }
 0x4d3   :  { %p4406_p9 = pnand %p4404_p8, %p4401_p7 }
 0x4d5   :  { %4409 = shalt.err (!%p4406_p9)
}
 0x4d6   :  { %3170 = dma.vmem_to_hbm [thread:$0]  %s3168_s3, 128, %s4840_s9, [#allocation4]  }
 0x4d7   :  { %4420 = dma.done.wait [#allocation4], 128  }
 0x4d8   :  { %4421 = vsyncadd [#allocation4], 4294967168 }
 0x4d9   :  { %3174 = vsyncpa [#allocation3], 1 }
 0x4da   :  { %3175 = vsyncpa [#allocation6], 1 }
 0x4db   :  { %3176 = vsyncpa [#allocation9], 1 }
 0x4dc   :  { %3177 = vsyncpa [#allocation12], 1 }
 0x4dd   :  { %3178 = vsyncpa [#allocation15], 1 }
 0x4de   :  { %3179 = vsyncpa [#allocation4], 1 }

</bundles_post_ra>
